<compile_context>
chip_gen: v7x
topology: tpu7x:2x2x1
jax: 0.10.0
libtpu: 0.0.40
codegen_flags: <defaults>
</compile_context>

<pallas_src>
import functools
import math

import jax
import jax.numpy as jnp
from jax import lax
from jax.experimental import pallas as pl
from jax.experimental.pallas import tpu as pltpu

LN_EPS = 1e-5

# q @ k^T without materializing a transpose: contract last axis of both.
_DN_T = (((1,), (1,)), ((), ()))


def _full_spec(shape):
    zeros = (0,) * len(shape)
    return pl.BlockSpec(shape, lambda: zeros)


# --------------------------------------------------------------------------
# Single fused kernel: Type-A heads + Type-B heads + W_O + 2 encoder layers
# --------------------------------------------------------------------------
def trans_layer_kernel(x1_ref, x2_ref, x3_ref,
                       w_qkv_ref, w_ali_ref, w_vb_ref, w_o_ref,
                       w_ein_ref, w_eout_ref, w_eff1_ref, w_eff2_ref, vec_ref,
                       o_ref, *, m1, m2, d_k1, d_v1, d_v2):
    x1 = x1_ref[...]                      # (N, dB)
    x2 = x2_ref[...]                      # (N, D2)
    x3 = x3_ref[...]                      # (N, dB)
    d_b = x1.shape[1]

    # ---- Type-A heads: one fused lane-dense QKV projection ----------------
    # [X1|X2] @ W  ==  X1 @ W[:dB] + X2 @ W[dB:]  (no in-kernel concat).
    w_qkv = w_qkv_ref[...]                # (D_A, m1*(2*d_k1+d_v1)) = (48, 128)
    qkv = (jnp.dot(x1, w_qkv[:d_b, :], preferred_element_type=jnp.float32) +
           jnp.dot(x2, w_qkv[d_b:, :], preferred_element_type=jnp.float32))

    inv_sqrt_dk = 1.0 / math.sqrt(d_k1)
    k_off = m1 * d_k1
    v_off = 2 * m1 * d_k1
    za_parts = []
    for i in range(m1):
        q = qkv[:, i * d_k1:(i + 1) * d_k1]                       # (N, d_k1)
        k = qkv[:, k_off + i * d_k1: k_off + (i + 1) * d_k1]      # (N, d_k1)
        v = qkv[:, v_off + i * d_v1: v_off + (i + 1) * d_v1]      # (N, d_v1)
        scores = lax.dot_general(q, k, dimension_numbers=_DN_T,
                                 preferred_element_type=jnp.float32)
        scores = scores * inv_sqrt_dk
        # softmax over dim=0 (per column), as in F.softmax(scores, dim=0)
        mx = jnp.max(scores, axis=0, keepdims=True)
        e = jnp.exp(scores - mx)
        s = e * pl.reciprocal(jnp.sum(e, axis=0, keepdims=True), approx=False)
        za_parts.append(jnp.dot(s, v, preferred_element_type=jnp.float32))

    # ---- Type-B heads (both heads in two matmuls) --------------------------
    xb = 1.0 / (1.0 + jnp.exp(-x3))                               # sigmoid(X3)
    ali = jnp.dot(xb, w_ali_ref[...], preferred_element_type=jnp.float32)    # (N, dB//2)
    zb_all = jnp.dot(x2, w_vb_ref[...], preferred_element_type=jnp.float32)  # (N, m2*d_v2)
    zzb = jnp.dot(ali, zb_all, preferred_element_type=jnp.float32)           # (N, m2*d_v2)

    # ---- Output projection: W_O^T has C on sublanes -> free row blocks -----
    w_o = w_o_ref[...]                    # (C, M) = (m1*d_v1 + m2*d_v2, M)
    z = jnp.dot(zzb, w_o[m1 * d_v1:, :], preferred_element_type=jnp.float32)
    for i in range(m1):
        z = z + jnp.dot(za_parts[i], w_o[i * d_v1:(i + 1) * d_v1, :],
                        preferred_element_type=jnp.float32)       # (N, M)

    # ---- Two post-norm nn.TransformerEncoderLayers (nhead=1, relu FFN) -----
    M = w_o.shape[1]
    d_ff = w_eff1_ref.shape[2]
    inv_sqrt_m = 1.0 / math.sqrt(M)
    for layer in range(2):
        w_in = w_ein_ref[layer]           # (M, 3M)  (in, out) layout
        w_out = w_eout_ref[layer]         # (M, M)
        w_ff1 = w_eff1_ref[layer]         # (M, d_ff)
        w_ff2 = w_eff2_ref[layer]         # (d_ff, M)
        vec = vec_ref[layer]              # (8, max(3M, d_ff)) packed vectors

        # single-head self-attention (seq_len = N, batch = 1)
        qkv_e = jnp.dot(z, w_in, preferred_element_type=jnp.float32) + vec[0:1, :3 * M]
        q = qkv_e[:, :M]
        k = qkv_e[:, M:2 * M]
        v = qkv_e[:, 2 * M:3 * M]
        sc = lax.dot_general(q, k, dimension_numbers=_DN_T,
                             preferred_element_type=jnp.float32) * inv_sqrt_m
        mx = jnp.max(sc, axis=-1, keepdims=True)
        e = jnp.exp(sc - mx)
        p = e * pl.reciprocal(jnp.sum(e, axis=-1, keepdims=True), approx=False)
        attn = jnp.dot(p, v, preferred_element_type=jnp.float32)
        attn = jnp.dot(attn, w_out, preferred_element_type=jnp.float32) + vec[1:2, :M]

        # residual + LayerNorm 1 (center once, reuse for var + norm)
        h = z + attn
        mu = jnp.mean(h, axis=-1, keepdims=True)
        c = h - mu
        var = jnp.mean(c * c, axis=-1, keepdims=True)
        y = c * lax.rsqrt(var + LN_EPS) * vec[4:5, :M] + vec[5:6, :M]

        # feed-forward (relu) + residual + LayerNorm 2
        f = jnp.maximum(
            jnp.dot(y, w_ff1, preferred_element_type=jnp.float32) + vec[2:3, :d_ff], 0.0)
        h2 = y + jnp.dot(f, w_ff2, preferred_element_type=jnp.float32) + vec[3:4, :M]
        mu2 = jnp.mean(h2, axis=-1, keepdims=True)
        c2 = h2 - mu2
        var2 = jnp.mean(c2 * c2, axis=-1, keepdims=True)
        z = c2 * lax.rsqrt(var2 + LN_EPS) * vec[6:7, :M] + vec[7:8, :M]

    o_ref[...] = z.astype(o_ref.dtype)


# --------------------------------------------------------------------------
# Wrapper: one pallas_call, everything VMEM-resident
# --------------------------------------------------------------------------
def trans_layer_forward(X1, X2, X3, kp, *, m1, m2, d_k1, d_v1, d_v2, M):
    n, d_b = X1.shape
    d2 = X2.shape[1]
    d_a = d_b + d2
    d_ff = kp["w_enc_ff1"].shape[2]
    hb = d_b // 2
    c = m1 * d_v1 + m2 * d_v2

    kernel = functools.partial(trans_layer_kernel, m1=m1, m2=m2,
                               d_k1=d_k1, d_v1=d_v1, d_v2=d_v2)
    args = (X1, X2, X3,
            kp["w_qkv_t"], kp["w_ali_t"], kp["w_vb_t"], kp["w_o_t"],
            kp["w_enc_in"], kp["w_enc_out"], kp["w_enc_ff1"], kp["w_enc_ff2"],
            kp["vec_pack"])

    flops = 2 * n * d_a * m1 * (2 * d_k1 + d_v1)                # fused QKV
    flops += 2 * m1 * n * n * (d_k1 + d_v1)                     # scores + S@V
    flops += 2 * (n * d_b * hb + n * d2 * m2 * d_v2 + n * hb * m2 * d_v2)
    flops += 2 * n * c * M                                      # W_O
    flops += 2 * 2 * (3 * n * M * M + 2 * n * n * M + n * M * M + 2 * n * M * d_ff)
    trans = m1 * n * n + n * d_b + 2 * n * n                    # exps (softmax, sigmoid)
    bytes_acc = 4 * (sum(a.size for a in args) + n * M)

    return pl.pallas_call(
        kernel,
        out_shape=jax.ShapeDtypeStruct((n, M), jnp.float32),
        in_specs=[_full_spec(a.shape) for a in args],
        out_specs=_full_spec((n, M)),
        cost_estimate=pl.CostEstimate(flops=flops, transcendentals=trans,
                                      bytes_accessed=bytes_acc),
    )(*args)


# --------------------------------------------------------------------------
# Parameters: PyTorch (out, in) layout for the reference; packed/transposed
# ONCE at init for the kernel (no per-call transposes or packing).
# --------------------------------------------------------------------------
def init_torch_params(key, *, input_dim_A, input_dim_B, m1, m2, d_k1, d_v1, d_v2, M):
    d2 = input_dim_A - input_dim_B
    hb = input_dim_B // 2
    d_ff = d_v1
    c = m1 * d_v1 + m2 * d_v2
    keys = jax.random.split(key, 8)

    def u(k, shape, fan_in):
        b = 1.0 / math.sqrt(fan_in)
        return jax.random.uniform(k, shape, jnp.float32, -b, b)

    def heads(k, out_dim, in_dim, n_heads):
        ks = jax.random.split(k, n_heads)
        return [u(kk, (out_dim, in_dim), in_dim) for kk in ks]

    tp = {
        "wq": heads(keys[0], d_k1, input_dim_A, m1),
        "wk": heads(keys[1], d_k1, input_dim_A, m1),
        "wv": heads(keys[2], d_v1, input_dim_A, m1),
        "wvb": heads(keys[3], d_v2, d2, m2),
        "w_ali": u(keys[4], (hb, input_dim_B), input_dim_B),
        "w_o": u(keys[5], (M, c), c),
    }

    def enc(kk):
        ks = jax.random.split(kk, 8)
        return {
            "w_in": u(ks[0], (3 * M, M), M),
            "b_in": u(ks[1], (3 * M,), M),
            "w_out": u(ks[2], (M, M), M),
            "b_out": u(ks[3], (M,), M),
            "w_ff1": u(ks[4], (d_ff, M), M),
            "b_ff1": u(ks[5], (d_ff,), M),
            "w_ff2": u(ks[6], (M, d_ff), d_ff),
            "b_ff2": u(ks[7], (M,), d_ff),
            "g1": jnp.ones((M,), jnp.float32),
            "be1": jnp.zeros((M,), jnp.float32),
            "g2": jnp.ones((M,), jnp.float32),
            "be2": jnp.zeros((M,), jnp.float32),
        }

    tp["enc1"] = enc(keys[6])
    tp["enc2"] = enc(keys[7])
    return tp


def pack_params(tp):
    # Q heads | K heads | V heads, each column block is one head's W.T.
    w_qkv_t = jnp.concatenate([w.T for w in tp["wq"]] +
                              [w.T for w in tp["wk"]] +
                              [w.T for w in tp["wv"]], axis=1)      # (D_A, 128)
    w_vb_t = jnp.concatenate([w.T for w in tp["wvb"]], axis=1)      # (D2, m2*d_v2)

    def enc_pack(lp):
        M = lp["w_out"].shape[0]
        d_ff = lp["w_ff1"].shape[0]
        width = max(3 * M, d_ff)

        def row(v):
            return jnp.zeros((width,), jnp.float32).at[: v.shape[0]].set(v)

        vec = jnp.stack([row(lp["b_in"]), row(lp["b_out"]), row(lp["b_ff1"]),
                         row(lp["b_ff2"]), row(lp["g1"]), row(lp["be1"]),
                         row(lp["g2"]), row(lp["be2"])])            # (8, width)
        return lp["w_in"].T, lp["w_out"].T, lp["w_ff1"].T, lp["w_ff2"].T, vec

    e1 = enc_pack(tp["enc1"])
    e2 = enc_pack(tp["enc2"])
    return {
        "w_qkv_t": w_qkv_t,
        "w_ali_t": tp["w_ali"].T,
        "w_vb_t": w_vb_t,
        "w_o_t": tp["w_o"].T,
        "w_enc_in": jnp.stack([e1[0], e2[0]]),
        "w_enc_out": jnp.stack([e1[1], e2[1]]),
        "w_enc_ff1": jnp.stack([e1[2], e2[2]]),
        "w_enc_ff2": jnp.stack([e1[3], e2[3]]),
        "vec_pack": jnp.stack([e1[4], e2[4]]),
    }


# --------------------------------------------------------------------------
# Pure-JAX reference (eval-mode forward, mirrors the PyTorch math per-head)
# --------------------------------------------------------------------------
def trans_layer_ref(X1, X2, X3, tp):
    xa = jnp.concatenate([X1, X2], axis=1)
    m1 = len(tp["wq"])
    m2 = len(tp["wvb"])
    d_k1 = tp["wq"][0].shape[0]

    za = []
    for i in range(m1):
        q = xa @ tp["wq"][i].T
        k = xa @ tp["wk"][i].T
        v = xa @ tp["wv"][i].T
        s = jax.nn.softmax(q @ k.T / math.sqrt(d_k1), axis=0)
        za.append(s @ v)

    xb = jax.nn.sigmoid(X3)
    zb = []
    for j in range(m2):
        zb.append((xb @ tp["w_ali"].T) @ (X2 @ tp["wvb"][j].T))

    z1 = jnp.concatenate(za + zb, axis=1) @ tp["w_o"].T

    def enc(x, lp):
        M = x.shape[1]
        wq, wk, wv = lp["w_in"][:M], lp["w_in"][M:2 * M], lp["w_in"][2 * M:]
        bq, bk, bv = lp["b_in"][:M], lp["b_in"][M:2 * M], lp["b_in"][2 * M:]
        q = x @ wq.T + bq
        k = x @ wk.T + bk
        v = x @ wv.T + bv
        a = jax.nn.softmax(q @ k.T / math.sqrt(M), axis=-1) @ v
        a = a @ lp["w_out"].T + lp["b_out"]
        h = x + a
        mu = h.mean(-1, keepdims=True)
        var = ((h - mu) ** 2).mean(-1, keepdims=True)
        y = (h - mu) / jnp.sqrt(var + LN_EPS) * lp["g1"] + lp["be1"]
        f = jnp.maximum(y @ lp["w_ff1"].T + lp["b_ff1"], 0.0)
        h2 = y + f @ lp["w_ff2"].T + lp["b_ff2"]
        mu2 = h2.mean(-1, keepdims=True)
        var2 = ((h2 - mu2) ** 2).mean(-1, keepdims=True)
        return (h2 - mu2) / jnp.sqrt(var2 + LN_EPS) * lp["g2"] + lp["be2"]

    z = enc(z1, tp["enc1"])
    return enc(z, tp["enc2"])


if __name__ == "__main__":
    # Shapes (small, consistent with the module's constraints):
    #   N = 8 must equal input_dim_B // 2 so that ali(X_B) @ (X2 @ W_V_B^T)
    #   is a valid matmul (as required by the PyTorch forward).
    N = 8
    input_dim_B = 16                       # X1: (8, 16), X3: (8, 16)
    input_dim_A = 48                       # X2: (8, 32), X_A: (8, 48)
    m1 = m2 = 2
    d_k1, d_v1, d_v2, M = 16, 32, 16, 32   # d_ff = d_v1 = 32

    key = jax.random.PRNGKey(0)
    k1, k2, k3, kp = jax.random.split(key, 4)
    X1 = jax.random.normal(k1, (N, input_dim_B), jnp.float32)
    X2 = jax.random.normal(k2, (N, input_dim_A - input_dim_B), jnp.float32)
    X3 = jax.random.normal(k3, (N, input_dim_B), jnp.float32)

    torch_params = init_torch_params(
        kp, input_dim_A=input_dim_A, input_dim_B=input_dim_B,
        m1=m1, m2=m2, d_k1=d_k1, d_v1=d_v1, d_v2=d_v2, M=M)
    kernel_params = pack_params(torch_params)

    fwd = jax.jit(functools.partial(trans_layer_forward, m1=m1, m2=m2,
                                    d_k1=d_k1, d_v1=d_v1, d_v2=d_v2, M=M))
    out = jax.block_until_ready(fwd(X1, X2, X3, kernel_params))

    ref = trans_layer_ref(X1, X2, X3, torch_params)
    assert out.shape == (N, M)
    err = jnp.max(jnp.abs(out - ref))
    assert jnp.allclose(out, ref, atol=1e-4, rtol=1e-4), f"max abs err = {err}"
    print("KERNEL_OK")
</pallas_src>

<mosaic_0001>
module attributes {stable_mosaic.version = 11 : i64} {
  func.func @trans_layer_kernel(%arg0: memref<8x16xf32, #tpu.memory_space<vmem>>, %arg1: memref<8x32xf32, #tpu.memory_space<vmem>>, %arg2: memref<8x16xf32, #tpu.memory_space<vmem>>, %arg3: memref<48x128xf32, #tpu.memory_space<vmem>>, %arg4: memref<16x8xf32, #tpu.memory_space<vmem>>, %arg5: memref<32x32xf32, #tpu.memory_space<vmem>>, %arg6: memref<96x32xf32, #tpu.memory_space<vmem>>, %arg7: memref<2x32x96xf32, #tpu.memory_space<vmem>>, %arg8: memref<2x32x32xf32, #tpu.memory_space<vmem>>, %arg9: memref<2x32x32xf32, #tpu.memory_space<vmem>>, %arg10: memref<2x32x32xf32, #tpu.memory_space<vmem>>, %arg11: memref<2x8x96xf32, #tpu.memory_space<vmem>>, %arg12: memref<8x32xf32, #tpu.memory_space<vmem>>) attributes {dimension_semantics = [], scalar_prefetch = 0 : i64, scratch_operands = 0 : i64, tpu.core_type = #tpu.core_type<tc>} {
    %c0 = arith.constant 0 : index
    %c0_0 = arith.constant 0 : index
    %0 = vector.load %arg0[%c0, %c0_0] : memref<8x16xf32, #tpu.memory_space<vmem>>, vector<8x16xf32>
    %c0_1 = arith.constant 0 : index
    %c0_2 = arith.constant 0 : index
    %1 = vector.load %arg1[%c0_1, %c0_2] : memref<8x32xf32, #tpu.memory_space<vmem>>, vector<8x32xf32>
    %c0_3 = arith.constant 0 : index
    %c0_4 = arith.constant 0 : index
    %2 = vector.load %arg2[%c0_3, %c0_4] : memref<8x16xf32, #tpu.memory_space<vmem>>, vector<8x16xf32>
    %c0_5 = arith.constant 0 : index
    %c0_6 = arith.constant 0 : index
    %3 = vector.load %arg3[%c0_5, %c0_6] : memref<48x128xf32, #tpu.memory_space<vmem>>, vector<48x128xf32>
    %4 = vector.extract_strided_slice %3 {offsets = [0, 0], sizes = [16, 128], strides = [1, 1]} : vector<48x128xf32> to vector<16x128xf32>
    %cst = arith.constant dense<0.000000e+00> : vector<8x128xf32>
    %5 = tpu.matmul %0, %4, %cst {dimension_numbers = #tpu.dot_dimension_numbers<[1], [0], [0], [1], [0, 0, 1, 1], [], []>} : vector<8x16xf32>, vector<16x128xf32>, vector<8x128xf32> -> vector<8x128xf32>
    %6 = vector.extract_strided_slice %3 {offsets = [16, 0], sizes = [32, 128], strides = [1, 1]} : vector<48x128xf32> to vector<32x128xf32>
    %cst_7 = arith.constant dense<0.000000e+00> : vector<8x128xf32>
    %7 = tpu.matmul %1, %6, %cst_7 {dimension_numbers = #tpu.dot_dimension_numbers<[1], [0], [0], [1], [0, 0, 1, 1], [], []>} : vector<8x32xf32>, vector<32x128xf32>, vector<8x128xf32> -> vector<8x128xf32>
    %8 = arith.addf %5, %7 : vector<8x128xf32>
    %9 = vector.extract_strided_slice %8 {offsets = [0, 0], sizes = [8, 16], strides = [1, 1]} : vector<8x128xf32> to vector<8x16xf32>
    %10 = vector.extract_strided_slice %8 {offsets = [0, 32], sizes = [8, 16], strides = [1, 1]} : vector<8x128xf32> to vector<8x16xf32>
    %11 = vector.extract_strided_slice %8 {offsets = [0, 64], sizes = [8, 32], strides = [1, 1]} : vector<8x128xf32> to vector<8x32xf32>
    %cst_8 = arith.constant dense<0.000000e+00> : vector<8x8xf32>
    %12 = tpu.matmul %9, %10, %cst_8 {dimension_numbers = #tpu.dot_dimension_numbers<[1], [1], [0], [0], [0, 0, 1, 0], [], []>} : vector<8x16xf32>, vector<8x16xf32>, vector<8x8xf32> -> vector<8x8xf32>
    %cst_9 = arith.constant 2.500000e-01 : f32
    %13 = vector.broadcast %cst_9 : f32 to vector<8x8xf32>
    %14 = arith.mulf %12, %13 : vector<8x8xf32>
    %cst_10 = arith.constant dense<0xFF800000> : vector<8xf32>
    %15 = vector.multi_reduction <maximumf>, %14, %cst_10 [0] : vector<8x8xf32> to vector<8xf32>
    %16 = vector.shape_cast %15 : vector<8xf32> to vector<1x8xf32>
    %17 = vector.broadcast %16 : vector<1x8xf32> to vector<8x8xf32>
    %18 = arith.subf %14, %17 : vector<8x8xf32>
    %19 = math.exp %18 : vector<8x8xf32>
    %cst_11 = arith.constant dense<0.000000e+00> : vector<8xf32>
    %20 = vector.multi_reduction <add>, %19, %cst_11 [0] : vector<8x8xf32> to vector<8xf32>
    %21 = vector.shape_cast %20 : vector<8xf32> to vector<1x8xf32>
    %22 = tpu.reciprocal %21 : vector<1x8xf32> -> vector<1x8xf32>
    %23 = vector.broadcast %22 : vector<1x8xf32> to vector<8x8xf32>
    %24 = arith.mulf %19, %23 : vector<8x8xf32>
    %cst_12 = arith.constant dense<0.000000e+00> : vector<8x32xf32>
    %25 = tpu.matmul %24, %11, %cst_12 {dimension_numbers = #tpu.dot_dimension_numbers<[1], [0], [0], [1], [0, 0, 1, 1], [], []>} : vector<8x8xf32>, vector<8x32xf32>, vector<8x32xf32> -> vector<8x32xf32>
    %26 = vector.extract_strided_slice %8 {offsets = [0, 16], sizes = [8, 16], strides = [1, 1]} : vector<8x128xf32> to vector<8x16xf32>
    %27 = vector.extract_strided_slice %8 {offsets = [0, 48], sizes = [8, 16], strides = [1, 1]} : vector<8x128xf32> to vector<8x16xf32>
    %28 = vector.extract_strided_slice %8 {offsets = [0, 96], sizes = [8, 32], strides = [1, 1]} : vector<8x128xf32> to vector<8x32xf32>
    %cst_13 = arith.constant dense<0.000000e+00> : vector<8x8xf32>
    %29 = tpu.matmul %26, %27, %cst_13 {dimension_numbers = #tpu.dot_dimension_numbers<[1], [1], [0], [0], [0, 0, 1, 0], [], []>} : vector<8x16xf32>, vector<8x16xf32>, vector<8x8xf32> -> vector<8x8xf32>
    %cst_14 = arith.constant 2.500000e-01 : f32
    %30 = vector.broadcast %cst_14 : f32 to vector<8x8xf32>
    %31 = arith.mulf %29, %30 : vector<8x8xf32>
    %cst_15 = arith.constant dense<0xFF800000> : vector<8xf32>
    %32 = vector.multi_reduction <maximumf>, %31, %cst_15 [0] : vector<8x8xf32> to vector<8xf32>
    %33 = vector.shape_cast %32 : vector<8xf32> to vector<1x8xf32>
    %34 = vector.broadcast %33 : vector<1x8xf32> to vector<8x8xf32>
    %35 = arith.subf %31, %34 : vector<8x8xf32>
    %36 = math.exp %35 : vector<8x8xf32>
    %cst_16 = arith.constant dense<0.000000e+00> : vector<8xf32>
    %37 = vector.multi_reduction <add>, %36, %cst_16 [0] : vector<8x8xf32> to vector<8xf32>
    %38 = vector.shape_cast %37 : vector<8xf32> to vector<1x8xf32>
    %39 = tpu.reciprocal %38 : vector<1x8xf32> -> vector<1x8xf32>
    %40 = vector.broadcast %39 : vector<1x8xf32> to vector<8x8xf32>
    %41 = arith.mulf %36, %40 : vector<8x8xf32>
    %cst_17 = arith.constant dense<0.000000e+00> : vector<8x32xf32>
    %42 = tpu.matmul %41, %28, %cst_17 {dimension_numbers = #tpu.dot_dimension_numbers<[1], [0], [0], [1], [0, 0, 1, 1], [], []>} : vector<8x8xf32>, vector<8x32xf32>, vector<8x32xf32> -> vector<8x32xf32>
    %cst_18 = arith.constant 0.000000e+00 : f32
    %43 = vector.broadcast %cst_18 : f32 to vector<8x16xf32>
    %44 = arith.subf %43, %2 : vector<8x16xf32>
    %45 = math.exp %44 : vector<8x16xf32>
    %cst_19 = arith.constant 1.000000e+00 : f32
    %46 = vector.broadcast %cst_19 : f32 to vector<8x16xf32>
    %47 = arith.addf %46, %45 : vector<8x16xf32>
    %cst_20 = arith.constant 1.000000e+00 : f32
    %48 = vector.broadcast %cst_20 : f32 to vector<8x16xf32>
    %49 = arith.divf %48, %47 : vector<8x16xf32>
    %c0_21 = arith.constant 0 : index
    %c0_22 = arith.constant 0 : index
    %50 = vector.load %arg4[%c0_21, %c0_22] : memref<16x8xf32, #tpu.memory_space<vmem>>, vector<16x8xf32>
    %cst_23 = arith.constant dense<0.000000e+00> : vector<8x8xf32>
    %51 = tpu.matmul %49, %50, %cst_23 {dimension_numbers = #tpu.dot_dimension_numbers<[1], [0], [0], [1], [0, 0, 1, 1], [], []>} : vector<8x16xf32>, vector<16x8xf32>, vector<8x8xf32> -> vector<8x8xf32>
    %c0_24 = arith.constant 0 : index
    %c0_25 = arith.constant 0 : index
    %52 = vector.load %arg5[%c0_24, %c0_25] : memref<32x32xf32, #tpu.memory_space<vmem>>, vector<32x32xf32>
    %cst_26 = arith.constant dense<0.000000e+00> : vector<8x32xf32>
    %53 = tpu.matmul %1, %52, %cst_26 {dimension_numbers = #tpu.dot_dimension_numbers<[1], [0], [0], [1], [0, 0, 1, 1], [], []>} : vector<8x32xf32>, vector<32x32xf32>, vector<8x32xf32> -> vector<8x32xf32>
    %cst_27 = arith.constant dense<0.000000e+00> : vector<8x32xf32>
    %54 = tpu.matmul %51, %53, %cst_27 {dimension_numbers = #tpu.dot_dimension_numbers<[1], [0], [0], [1], [0, 0, 1, 1], [], []>} : vector<8x8xf32>, vector<8x32xf32>, vector<8x32xf32> -> vector<8x32xf32>
    %c0_28 = arith.constant 0 : index
    %c0_29 = arith.constant 0 : index
    %55 = vector.load %arg6[%c0_28, %c0_29] : memref<96x32xf32, #tpu.memory_space<vmem>>, vector<96x32xf32>
    %56 = vector.extract_strided_slice %55 {offsets = [64, 0], sizes = [32, 32], strides = [1, 1]} : vector<96x32xf32> to vector<32x32xf32>
    %cst_30 = arith.constant dense<0.000000e+00> : vector<8x32xf32>
    %57 = tpu.matmul %54, %56, %cst_30 {dimension_numbers = #tpu.dot_dimension_numbers<[1], [0], [0], [1], [0, 0, 1, 1], [], []>} : vector<8x32xf32>, vector<32x32xf32>, vector<8x32xf32> -> vector<8x32xf32>
    %58 = vector.extract_strided_slice %55 {offsets = [0, 0], sizes = [32, 32], strides = [1, 1]} : vector<96x32xf32> to vector<32x32xf32>
    %cst_31 = arith.constant dense<0.000000e+00> : vector<8x32xf32>
    %59 = tpu.matmul %25, %58, %cst_31 {dimension_numbers = #tpu.dot_dimension_numbers<[1], [0], [0], [1], [0, 0, 1, 1], [], []>} : vector<8x32xf32>, vector<32x32xf32>, vector<8x32xf32> -> vector<8x32xf32>
    %60 = arith.addf %57, %59 : vector<8x32xf32>
    %61 = vector.extract_strided_slice %55 {offsets = [32, 0], sizes = [32, 32], strides = [1, 1]} : vector<96x32xf32> to vector<32x32xf32>
    %cst_32 = arith.constant dense<0.000000e+00> : vector<8x32xf32>
    %62 = tpu.matmul %42, %61, %cst_32 {dimension_numbers = #tpu.dot_dimension_numbers<[1], [0], [0], [1], [0, 0, 1, 1], [], []>} : vector<8x32xf32>, vector<32x32xf32>, vector<8x32xf32> -> vector<8x32xf32>
    %63 = arith.addf %60, %62 : vector<8x32xf32>
    %c0_33 = arith.constant 0 : index
    %c0_34 = arith.constant 0 : index
    %c0_35 = arith.constant 0 : index
    %64 = vector.load %arg7[%c0_33, %c0_34, %c0_35] : memref<2x32x96xf32, #tpu.memory_space<vmem>>, vector<1x32x96xf32>
    %65 = vector.shape_cast %64 : vector<1x32x96xf32> to vector<32x96xf32>
    %c0_36 = arith.constant 0 : index
    %c0_37 = arith.constant 0 : index
    %c0_38 = arith.constant 0 : index
    %66 = vector.load %arg8[%c0_36, %c0_37, %c0_38] : memref<2x32x32xf32, #tpu.memory_space<vmem>>, vector<1x32x32xf32>
    %67 = vector.shape_cast %66 : vector<1x32x32xf32> to vector<32x32xf32>
    %c0_39 = arith.constant 0 : index
    %c0_40 = arith.constant 0 : index
    %c0_41 = arith.constant 0 : index
    %68 = vector.load %arg9[%c0_39, %c0_40, %c0_41] : memref<2x32x32xf32, #tpu.memory_space<vmem>>, vector<1x32x32xf32>
    %69 = vector.shape_cast %68 : vector<1x32x32xf32> to vector<32x32xf32>
    %c0_42 = arith.constant 0 : index
    %c0_43 = arith.constant 0 : index
    %c0_44 = arith.constant 0 : index
    %70 = vector.load %arg10[%c0_42, %c0_43, %c0_44] : memref<2x32x32xf32, #tpu.memory_space<vmem>>, vector<1x32x32xf32>
    %71 = vector.shape_cast %70 : vector<1x32x32xf32> to vector<32x32xf32>
    %c0_45 = arith.constant 0 : index
    %c0_46 = arith.constant 0 : index
    %c0_47 = arith.constant 0 : index
    %72 = vector.load %arg11[%c0_45, %c0_46, %c0_47] : memref<2x8x96xf32, #tpu.memory_space<vmem>>, vector<1x8x96xf32>
    %73 = vector.shape_cast %72 : vector<1x8x96xf32> to vector<8x96xf32>
    %cst_48 = arith.constant dense<0.000000e+00> : vector<8x96xf32>
    %74 = tpu.matmul %63, %65, %cst_48 {dimension_numbers = #tpu.dot_dimension_numbers<[1], [0], [0], [1], [0, 0, 1, 1], [], []>} : vector<8x32xf32>, vector<32x96xf32>, vector<8x96xf32> -> vector<8x96xf32>
    %75 = vector.extract_strided_slice %73 {offsets = [0, 0], sizes = [1, 96], strides = [1, 1]} : vector<8x96xf32> to vector<1x96xf32>
    %76 = vector.broadcast %75 : vector<1x96xf32> to vector<8x96xf32>
    %77 = arith.addf %74, %76 : vector<8x96xf32>
    %78 = vector.extract_strided_slice %77 {offsets = [0, 0], sizes = [8, 32], strides = [1, 1]} : vector<8x96xf32> to vector<8x32xf32>
    %79 = vector.extract_strided_slice %77 {offsets = [0, 32], sizes = [8, 32], strides = [1, 1]} : vector<8x96xf32> to vector<8x32xf32>
    %80 = vector.extract_strided_slice %77 {offsets = [0, 64], sizes = [8, 32], strides = [1, 1]} : vector<8x96xf32> to vector<8x32xf32>
    %cst_49 = arith.constant dense<0.000000e+00> : vector<8x8xf32>
    %81 = tpu.matmul %78, %79, %cst_49 {dimension_numbers = #tpu.dot_dimension_numbers<[1], [1], [0], [0], [0, 0, 1, 0], [], []>} : vector<8x32xf32>, vector<8x32xf32>, vector<8x8xf32> -> vector<8x8xf32>
    %cst_50 = arith.constant 0.176776692 : f32
    %82 = vector.broadcast %cst_50 : f32 to vector<8x8xf32>
    %83 = arith.mulf %81, %82 : vector<8x8xf32>
    %cst_51 = arith.constant dense<0xFF800000> : vector<8xf32>
    %84 = vector.multi_reduction <maximumf>, %83, %cst_51 [1] : vector<8x8xf32> to vector<8xf32>
    %85 = vector.shape_cast %84 : vector<8xf32> to vector<8x1xf32>
    %86 = vector.broadcast %85 : vector<8x1xf32> to vector<8x8xf32>
    %87 = arith.subf %83, %86 : vector<8x8xf32>
    %88 = math.exp %87 : vector<8x8xf32>
    %cst_52 = arith.constant dense<0.000000e+00> : vector<8xf32>
    %89 = vector.multi_reduction <add>, %88, %cst_52 [1] : vector<8x8xf32> to vector<8xf32>
    %90 = vector.shape_cast %89 : vector<8xf32> to vector<8x1xf32>
    %91 = tpu.reciprocal %90 : vector<8x1xf32> -> vector<8x1xf32>
    %92 = vector.broadcast %91 : vector<8x1xf32> to vector<8x8xf32>
    %93 = arith.mulf %88, %92 : vector<8x8xf32>
    %cst_53 = arith.constant dense<0.000000e+00> : vector<8x32xf32>
    %94 = tpu.matmul %93, %80, %cst_53 {dimension_numbers = #tpu.dot_dimension_numbers<[1], [0], [0], [1], [0, 0, 1, 1], [], []>} : vector<8x8xf32>, vector<8x32xf32>, vector<8x32xf32> -> vector<8x32xf32>
    %cst_54 = arith.constant dense<0.000000e+00> : vector<8x32xf32>
    %95 = tpu.matmul %94, %67, %cst_54 {dimension_numbers = #tpu.dot_dimension_numbers<[1], [0], [0], [1], [0, 0, 1, 1], [], []>} : vector<8x32xf32>, vector<32x32xf32>, vector<8x32xf32> -> vector<8x32xf32>
    %96 = vector.extract_strided_slice %73 {offsets = [1, 0], sizes = [1, 32], strides = [1, 1]} : vector<8x96xf32> to vector<1x32xf32>
    %97 = vector.broadcast %96 : vector<1x32xf32> to vector<8x32xf32>
    %98 = arith.addf %95, %97 : vector<8x32xf32>
    %99 = arith.addf %63, %98 : vector<8x32xf32>
    %cst_55 = arith.constant dense<0.000000e+00> : vector<8xf32>
    %100 = vector.multi_reduction <add>, %99, %cst_55 [1] : vector<8x32xf32> to vector<8xf32>
    %101 = vector.shape_cast %100 : vector<8xf32> to vector<8x1xf32>
    %cst_56 = arith.constant 3.200000e+01 : f32
    %102 = vector.broadcast %cst_56 : f32 to vector<8x1xf32>
    %103 = arith.divf %101, %102 : vector<8x1xf32>
    %104 = vector.broadcast %103 : vector<8x1xf32> to vector<8x32xf32>
    %105 = arith.subf %99, %104 : vector<8x32xf32>
    %106 = arith.mulf %105, %105 : vector<8x32xf32>
    %cst_57 = arith.constant dense<0.000000e+00> : vector<8xf32>
    %107 = vector.multi_reduction <add>, %106, %cst_57 [1] : vector<8x32xf32> to vector<8xf32>
    %108 = vector.shape_cast %107 : vector<8xf32> to vector<8x1xf32>
    %cst_58 = arith.constant 3.200000e+01 : f32
    %109 = vector.broadcast %cst_58 : f32 to vector<8x1xf32>
    %110 = arith.divf %108, %109 : vector<8x1xf32>
    %cst_59 = arith.constant 9.99999974E-6 : f32
    %111 = vector.broadcast %cst_59 : f32 to vector<8x1xf32>
    %112 = arith.addf %110, %111 : vector<8x1xf32>
    %113 = math.rsqrt %112 : vector<8x1xf32>
    %114 = vector.broadcast %113 : vector<8x1xf32> to vector<8x32xf32>
    %115 = arith.mulf %105, %114 : vector<8x32xf32>
    %116 = vector.extract_strided_slice %73 {offsets = [4, 0], sizes = [1, 32], strides = [1, 1]} : vector<8x96xf32> to vector<1x32xf32>
    %117 = vector.broadcast %116 : vector<1x32xf32> to vector<8x32xf32>
    %118 = arith.mulf %115, %117 : vector<8x32xf32>
    %119 = vector.extract_strided_slice %73 {offsets = [5, 0], sizes = [1, 32], strides = [1, 1]} : vector<8x96xf32> to vector<1x32xf32>
    %120 = vector.broadcast %119 : vector<1x32xf32> to vector<8x32xf32>
    %121 = arith.addf %118, %120 : vector<8x32xf32>
    %cst_60 = arith.constant dense<0.000000e+00> : vector<8x32xf32>
    %122 = tpu.matmul %121, %69, %cst_60 {dimension_numbers = #tpu.dot_dimension_numbers<[1], [0], [0], [1], [0, 0, 1, 1], [], []>} : vector<8x32xf32>, vector<32x32xf32>, vector<8x32xf32> -> vector<8x32xf32>
    %123 = vector.extract_strided_slice %73 {offsets = [2, 0], sizes = [1, 32], strides = [1, 1]} : vector<8x96xf32> to vector<1x32xf32>
    %124 = vector.broadcast %123 : vector<1x32xf32> to vector<8x32xf32>
    %125 = arith.addf %122, %124 : vector<8x32xf32>
    %cst_61 = arith.constant 0.000000e+00 : f32
    %126 = vector.broadcast %cst_61 : f32 to vector<8x32xf32>
    %127 = arith.maximumf %125, %126 : vector<8x32xf32>
    %cst_62 = arith.constant dense<0.000000e+00> : vector<8x32xf32>
    %128 = tpu.matmul %127, %71, %cst_62 {dimension_numbers = #tpu.dot_dimension_numbers<[1], [0], [0], [1], [0, 0, 1, 1], [], []>} : vector<8x32xf32>, vector<32x32xf32>, vector<8x32xf32> -> vector<8x32xf32>
    %129 = arith.addf %121, %128 : vector<8x32xf32>
    %130 = vector.extract_strided_slice %73 {offsets = [3, 0], sizes = [1, 32], strides = [1, 1]} : vector<8x96xf32> to vector<1x32xf32>
    %131 = vector.broadcast %130 : vector<1x32xf32> to vector<8x32xf32>
    %132 = arith.addf %129, %131 : vector<8x32xf32>
    %cst_63 = arith.constant dense<0.000000e+00> : vector<8xf32>
    %133 = vector.multi_reduction <add>, %132, %cst_63 [1] : vector<8x32xf32> to vector<8xf32>
    %134 = vector.shape_cast %133 : vector<8xf32> to vector<8x1xf32>
    %cst_64 = arith.constant 3.200000e+01 : f32
    %135 = vector.broadcast %cst_64 : f32 to vector<8x1xf32>
    %136 = arith.divf %134, %135 : vector<8x1xf32>
    %137 = vector.broadcast %136 : vector<8x1xf32> to vector<8x32xf32>
    %138 = arith.subf %132, %137 : vector<8x32xf32>
    %139 = arith.mulf %138, %138 : vector<8x32xf32>
    %cst_65 = arith.constant dense<0.000000e+00> : vector<8xf32>
    %140 = vector.multi_reduction <add>, %139, %cst_65 [1] : vector<8x32xf32> to vector<8xf32>
    %141 = vector.shape_cast %140 : vector<8xf32> to vector<8x1xf32>
    %cst_66 = arith.constant 3.200000e+01 : f32
    %142 = vector.broadcast %cst_66 : f32 to vector<8x1xf32>
    %143 = arith.divf %141, %142 : vector<8x1xf32>
    %cst_67 = arith.constant 9.99999974E-6 : f32
    %144 = vector.broadcast %cst_67 : f32 to vector<8x1xf32>
    %145 = arith.addf %143, %144 : vector<8x1xf32>
    %146 = math.rsqrt %145 : vector<8x1xf32>
    %147 = vector.broadcast %146 : vector<8x1xf32> to vector<8x32xf32>
    %148 = arith.mulf %138, %147 : vector<8x32xf32>
    %149 = vector.extract_strided_slice %73 {offsets = [6, 0], sizes = [1, 32], strides = [1, 1]} : vector<8x96xf32> to vector<1x32xf32>
    %150 = vector.broadcast %149 : vector<1x32xf32> to vector<8x32xf32>
    %151 = arith.mulf %148, %150 : vector<8x32xf32>
    %152 = vector.extract_strided_slice %73 {offsets = [7, 0], sizes = [1, 32], strides = [1, 1]} : vector<8x96xf32> to vector<1x32xf32>
    %153 = vector.broadcast %152 : vector<1x32xf32> to vector<8x32xf32>
    %154 = arith.addf %151, %153 : vector<8x32xf32>
    %c1 = arith.constant 1 : index
    %c0_68 = arith.constant 0 : index
    %c0_69 = arith.constant 0 : index
    %155 = vector.load %arg7[%c1, %c0_68, %c0_69] : memref<2x32x96xf32, #tpu.memory_space<vmem>>, vector<1x32x96xf32>
    %156 = vector.shape_cast %155 : vector<1x32x96xf32> to vector<32x96xf32>
    %c1_70 = arith.constant 1 : index
    %c0_71 = arith.constant 0 : index
    %c0_72 = arith.constant 0 : index
    %157 = vector.load %arg8[%c1_70, %c0_71, %c0_72] : memref<2x32x32xf32, #tpu.memory_space<vmem>>, vector<1x32x32xf32>
    %158 = vector.shape_cast %157 : vector<1x32x32xf32> to vector<32x32xf32>
    %c1_73 = arith.constant 1 : index
    %c0_74 = arith.constant 0 : index
    %c0_75 = arith.constant 0 : index
    %159 = vector.load %arg9[%c1_73, %c0_74, %c0_75] : memref<2x32x32xf32, #tpu.memory_space<vmem>>, vector<1x32x32xf32>
    %160 = vector.shape_cast %159 : vector<1x32x32xf32> to vector<32x32xf32>
    %c1_76 = arith.constant 1 : index
    %c0_77 = arith.constant 0 : index
    %c0_78 = arith.constant 0 : index
    %161 = vector.load %arg10[%c1_76, %c0_77, %c0_78] : memref<2x32x32xf32, #tpu.memory_space<vmem>>, vector<1x32x32xf32>
    %162 = vector.shape_cast %161 : vector<1x32x32xf32> to vector<32x32xf32>
    %c1_79 = arith.constant 1 : index
    %c0_80 = arith.constant 0 : index
    %c0_81 = arith.constant 0 : index
    %163 = vector.load %arg11[%c1_79, %c0_80, %c0_81] : memref<2x8x96xf32, #tpu.memory_space<vmem>>, vector<1x8x96xf32>
    %164 = vector.shape_cast %163 : vector<1x8x96xf32> to vector<8x96xf32>
    %cst_82 = arith.constant dense<0.000000e+00> : vector<8x96xf32>
    %165 = tpu.matmul %154, %156, %cst_82 {dimension_numbers = #tpu.dot_dimension_numbers<[1], [0], [0], [1], [0, 0, 1, 1], [], []>} : vector<8x32xf32>, vector<32x96xf32>, vector<8x96xf32> -> vector<8x96xf32>
    %166 = vector.extract_strided_slice %164 {offsets = [0, 0], sizes = [1, 96], strides = [1, 1]} : vector<8x96xf32> to vector<1x96xf32>
    %167 = vector.broadcast %166 : vector<1x96xf32> to vector<8x96xf32>
    %168 = arith.addf %165, %167 : vector<8x96xf32>
    %169 = vector.extract_strided_slice %168 {offsets = [0, 0], sizes = [8, 32], strides = [1, 1]} : vector<8x96xf32> to vector<8x32xf32>
    %170 = vector.extract_strided_slice %168 {offsets = [0, 32], sizes = [8, 32], strides = [1, 1]} : vector<8x96xf32> to vector<8x32xf32>
    %171 = vector.extract_strided_slice %168 {offsets = [0, 64], sizes = [8, 32], strides = [1, 1]} : vector<8x96xf32> to vector<8x32xf32>
    %cst_83 = arith.constant dense<0.000000e+00> : vector<8x8xf32>
    %172 = tpu.matmul %169, %170, %cst_83 {dimension_numbers = #tpu.dot_dimension_numbers<[1], [1], [0], [0], [0, 0, 1, 0], [], []>} : vector<8x32xf32>, vector<8x32xf32>, vector<8x8xf32> -> vector<8x8xf32>
    %cst_84 = arith.constant 0.176776692 : f32
    %173 = vector.broadcast %cst_84 : f32 to vector<8x8xf32>
    %174 = arith.mulf %172, %173 : vector<8x8xf32>
    %cst_85 = arith.constant dense<0xFF800000> : vector<8xf32>
    %175 = vector.multi_reduction <maximumf>, %174, %cst_85 [1] : vector<8x8xf32> to vector<8xf32>
    %176 = vector.shape_cast %175 : vector<8xf32> to vector<8x1xf32>
    %177 = vector.broadcast %176 : vector<8x1xf32> to vector<8x8xf32>
    %178 = arith.subf %174, %177 : vector<8x8xf32>
    %179 = math.exp %178 : vector<8x8xf32>
    %cst_86 = arith.constant dense<0.000000e+00> : vector<8xf32>
    %180 = vector.multi_reduction <add>, %179, %cst_86 [1] : vector<8x8xf32> to vector<8xf32>
    %181 = vector.shape_cast %180 : vector<8xf32> to vector<8x1xf32>
    %182 = tpu.reciprocal %181 : vector<8x1xf32> -> vector<8x1xf32>
    %183 = vector.broadcast %182 : vector<8x1xf32> to vector<8x8xf32>
    %184 = arith.mulf %179, %183 : vector<8x8xf32>
    %cst_87 = arith.constant dense<0.000000e+00> : vector<8x32xf32>
    %185 = tpu.matmul %184, %171, %cst_87 {dimension_numbers = #tpu.dot_dimension_numbers<[1], [0], [0], [1], [0, 0, 1, 1], [], []>} : vector<8x8xf32>, vector<8x32xf32>, vector<8x32xf32> -> vector<8x32xf32>
    %cst_88 = arith.constant dense<0.000000e+00> : vector<8x32xf32>
    %186 = tpu.matmul %185, %158, %cst_88 {dimension_numbers = #tpu.dot_dimension_numbers<[1], [0], [0], [1], [0, 0, 1, 1], [], []>} : vector<8x32xf32>, vector<32x32xf32>, vector<8x32xf32> -> vector<8x32xf32>
    %187 = vector.extract_strided_slice %164 {offsets = [1, 0], sizes = [1, 32], strides = [1, 1]} : vector<8x96xf32> to vector<1x32xf32>
    %188 = vector.broadcast %187 : vector<1x32xf32> to vector<8x32xf32>
    %189 = arith.addf %186, %188 : vector<8x32xf32>
    %190 = arith.addf %154, %189 : vector<8x32xf32>
    %cst_89 = arith.constant dense<0.000000e+00> : vector<8xf32>
    %191 = vector.multi_reduction <add>, %190, %cst_89 [1] : vector<8x32xf32> to vector<8xf32>
    %192 = vector.shape_cast %191 : vector<8xf32> to vector<8x1xf32>
    %cst_90 = arith.constant 3.200000e+01 : f32
    %193 = vector.broadcast %cst_90 : f32 to vector<8x1xf32>
    %194 = arith.divf %192, %193 : vector<8x1xf32>
    %195 = vector.broadcast %194 : vector<8x1xf32> to vector<8x32xf32>
    %196 = arith.subf %190, %195 : vector<8x32xf32>
    %197 = arith.mulf %196, %196 : vector<8x32xf32>
    %cst_91 = arith.constant dense<0.000000e+00> : vector<8xf32>
    %198 = vector.multi_reduction <add>, %197, %cst_91 [1] : vector<8x32xf32> to vector<8xf32>
    %199 = vector.shape_cast %198 : vector<8xf32> to vector<8x1xf32>
    %cst_92 = arith.constant 3.200000e+01 : f32
    %200 = vector.broadcast %cst_92 : f32 to vector<8x1xf32>
    %201 = arith.divf %199, %200 : vector<8x1xf32>
    %cst_93 = arith.constant 9.99999974E-6 : f32
    %202 = vector.broadcast %cst_93 : f32 to vector<8x1xf32>
    %203 = arith.addf %201, %202 : vector<8x1xf32>
    %204 = math.rsqrt %203 : vector<8x1xf32>
    %205 = vector.broadcast %204 : vector<8x1xf32> to vector<8x32xf32>
    %206 = arith.mulf %196, %205 : vector<8x32xf32>
    %207 = vector.extract_strided_slice %164 {offsets = [4, 0], sizes = [1, 32], strides = [1, 1]} : vector<8x96xf32> to vector<1x32xf32>
    %208 = vector.broadcast %207 : vector<1x32xf32> to vector<8x32xf32>
    %209 = arith.mulf %206, %208 : vector<8x32xf32>
    %210 = vector.extract_strided_slice %164 {offsets = [5, 0], sizes = [1, 32], strides = [1, 1]} : vector<8x96xf32> to vector<1x32xf32>
    %211 = vector.broadcast %210 : vector<1x32xf32> to vector<8x32xf32>
    %212 = arith.addf %209, %211 : vector<8x32xf32>
    %cst_94 = arith.constant dense<0.000000e+00> : vector<8x32xf32>
    %213 = tpu.matmul %212, %160, %cst_94 {dimension_numbers = #tpu.dot_dimension_numbers<[1], [0], [0], [1], [0, 0, 1, 1], [], []>} : vector<8x32xf32>, vector<32x32xf32>, vector<8x32xf32> -> vector<8x32xf32>
    %214 = vector.extract_strided_slice %164 {offsets = [2, 0], sizes = [1, 32], strides = [1, 1]} : vector<8x96xf32> to vector<1x32xf32>
    %215 = vector.broadcast %214 : vector<1x32xf32> to vector<8x32xf32>
    %216 = arith.addf %213, %215 : vector<8x32xf32>
    %cst_95 = arith.constant 0.000000e+00 : f32
    %217 = vector.broadcast %cst_95 : f32 to vector<8x32xf32>
    %218 = arith.maximumf %216, %217 : vector<8x32xf32>
    %cst_96 = arith.constant dense<0.000000e+00> : vector<8x32xf32>
    %219 = tpu.matmul %218, %162, %cst_96 {dimension_numbers = #tpu.dot_dimension_numbers<[1], [0], [0], [1], [0, 0, 1, 1], [], []>} : vector<8x32xf32>, vector<32x32xf32>, vector<8x32xf32> -> vector<8x32xf32>
    %220 = arith.addf %212, %219 : vector<8x32xf32>
    %221 = vector.extract_strided_slice %164 {offsets = [3, 0], sizes = [1, 32], strides = [1, 1]} : vector<8x96xf32> to vector<1x32xf32>
    %222 = vector.broadcast %221 : vector<1x32xf32> to vector<8x32xf32>
    %223 = arith.addf %220, %222 : vector<8x32xf32>
    %cst_97 = arith.constant dense<0.000000e+00> : vector<8xf32>
    %224 = vector.multi_reduction <add>, %223, %cst_97 [1] : vector<8x32xf32> to vector<8xf32>
    %225 = vector.shape_cast %224 : vector<8xf32> to vector<8x1xf32>
    %cst_98 = arith.constant 3.200000e+01 : f32
    %226 = vector.broadcast %cst_98 : f32 to vector<8x1xf32>
    %227 = arith.divf %225, %226 : vector<8x1xf32>
    %228 = vector.broadcast %227 : vector<8x1xf32> to vector<8x32xf32>
    %229 = arith.subf %223, %228 : vector<8x32xf32>
    %230 = arith.mulf %229, %229 : vector<8x32xf32>
    %cst_99 = arith.constant dense<0.000000e+00> : vector<8xf32>
    %231 = vector.multi_reduction <add>, %230, %cst_99 [1] : vector<8x32xf32> to vector<8xf32>
    %232 = vector.shape_cast %231 : vector<8xf32> to vector<8x1xf32>
    %cst_100 = arith.constant 3.200000e+01 : f32
    %233 = vector.broadcast %cst_100 : f32 to vector<8x1xf32>
    %234 = arith.divf %232, %233 : vector<8x1xf32>
    %cst_101 = arith.constant 9.99999974E-6 : f32
    %235 = vector.broadcast %cst_101 : f32 to vector<8x1xf32>
    %236 = arith.addf %234, %235 : vector<8x1xf32>
    %237 = math.rsqrt %236 : vector<8x1xf32>
    %238 = vector.broadcast %237 : vector<8x1xf32> to vector<8x32xf32>
    %239 = arith.mulf %229, %238 : vector<8x32xf32>
    %240 = vector.extract_strided_slice %164 {offsets = [6, 0], sizes = [1, 32], strides = [1, 1]} : vector<8x96xf32> to vector<1x32xf32>
    %241 = vector.broadcast %240 : vector<1x32xf32> to vector<8x32xf32>
    %242 = arith.mulf %239, %241 : vector<8x32xf32>
    %243 = vector.extract_strided_slice %164 {offsets = [7, 0], sizes = [1, 32], strides = [1, 1]} : vector<8x96xf32> to vector<1x32xf32>
    %244 = vector.broadcast %243 : vector<1x32xf32> to vector<8x32xf32>
    %245 = arith.addf %242, %244 : vector<8x32xf32>
    %c0_102 = arith.constant 0 : index
    %c0_103 = arith.constant 0 : index
    %246 = vector.load %arg12[%c0_102, %c0_103] : memref<8x32xf32, #tpu.memory_space<vmem>>, vector<8x32xf32>
    tpu.vector_store %arg12[%c0_102, %c0_103], %245 {strides = array<i32>} : memref<8x32xf32, #tpu.memory_space<vmem>>, vector<8x32xf32>,
    return
  }
}

</mosaic_0001>

<bundles_post_ra>
// kernel: trans_layer_forward.1
= control target key start
LH: loop header
LB: loop body
LE: loop exit
PB: predicated region body
PF: predicated region fallthrough
CT: control target
= control target key end

     0   :  { %17 = vsyncpa [#allocation3], 0  ;;  %s3368_s0 = inlined_call_operand.hbm [shape: f32[8,16], index: 0, kind: input, shape index: {}]   ;;  %s3369_s1 = inlined_call_operand.hbm [shape: f32[8,32], index: 1, kind: input, shape index: {}]   ;;  %s3370_s2 = inlined_call_operand.hbm [shape: f32[8,16], index: 2, kind: input, shape index: {}]   ;;  %s3371_s3 = inlined_call_operand.vmem [shape: f32[48,128], index: 3, kind: input, shape index: {}]   ;;  %s3372_s4 = inlined_call_operand.vmem [shape: f32[16,8], index: 4, kind: input, shape index: {}]   ;;  %s3373_s5 = inlined_call_operand.hbm [shape: f32[32,32], index: 5, kind: input, shape index: {}]   ;;  %s3374_s6 = inlined_call_operand.vmem [shape: f32[96,32], index: 6, kind: input, shape index: {}]   ;;  %s3375_s7 = inlined_call_operand.vmem [shape: f32[2,32,96], index: 7, kind: input, shape index: {}]   ;;  %s3376_s8 = inlined_call_operand.vmem [shape: f32[2,32,32], index: 8, kind: input, shape index: {}]   ;;  %s3377_s9 = inlined_call_operand.hbm [shape: f32[2,32,32], index: 9, kind: input, shape index: {}]   ;;  %s3378_s10 = inlined_call_operand.hbm [shape: f32[2,32,32], index: 10, kind: input, shape index: {}]   ;;  %s3379_s11 = inlined_call_operand.hbm [shape: f32[2,8,96], index: 11, kind: input, shape index: {}]   ;;  %s3380_s12 = inlined_call_operand.hbm [shape: f32[8,32], index: 12, kind: output, shape index: {}]  }
   0x1   :  { %18 = vsyncpa [#allocation6], 0 }
   0x2   :  { %19 = vsyncpa [#allocation9], 0 }
   0x3   :  { %20 = vsyncpa [#allocation12], 0 }
   0x4   :  { %21 = vsyncpa [#allocation4], 0  ;;  %s2850_s21 = smov [#allocation5]   ;;  %s2851_s23 = smov [#allocation8]  }
   0x5   :  { %s38_s22 = sshll.u32 %s2850_s21, 4  ;;  %s61_s24 = sshll.u32 %s2851_s23, 4  ;;  %s39_s22 = int_to_ptr.vmem [resolvable:$true] %s38_s22  ;;  %s2933_s24 = int_to_ptr.vmem [resolvable:$true] %s61_s24 }
   0x6   :  { %s2664_s27 = scalar_lea.hbm %s3369_s1, 128 }
   0x7   :  { %p2665_p0 = scmp.ne.s32.totalorder %s3369_s1, %s2664_s27  ;;  %p2668_p1 = scmp.lt.u32.totalorder %s2664_s27, %s3369_s1 }
   0x9   :  { %p2670_p2 = pnand %p2668_p1, %p2665_p0 }
   0xb   :  { %2673 = shalt.err (!%p2670_p2)
}
   0xc   :  { %s2674_s14 = scalar_lea.vmem %s39_s22, 128  ;;  %p2679_p4 = scmp.lt.s32.totalorder %s39_s22, %s39_s22 }
   0xd   :  { %p2675_p3 = scmp.ne.s32.totalorder %s39_s22, %s2674_s14  ;;  %p2680_p5 = scmp.lt.s32.totalorder %s2674_s14, %s2674_s14 }
   0xf   :  { %p2681_p6 = por %p2680_p5, %p2679_p4 }
  0x11   :  { %p2682_p7 = pnand %p2681_p6, %p2675_p3 }
  0x13   :  { %2685 = shalt.err (!%p2682_p7)
}
  0x14   :  { %41 = dma.hbm_to_vmem [thread:$0]  %s3369_s1, 128, %s39_s22, [#allocation6]  }
  0x15   :  { %s2686_s19 = scalar_lea.hbm %s3373_s5, 512 }
  0x16   :  { %p2687_p8 = scmp.ne.s32.totalorder %s3373_s5, %s2686_s19  ;;  %p2690_p9 = scmp.lt.u32.totalorder %s2686_s19, %s3373_s5 }
  0x18   :  { %p2692_p10 = pnand %p2690_p9, %p2687_p8 }
  0x1a   :  { %2695 = shalt.err (!%p2692_p10)
}
  0x1b   :  { %s2696_s26 = scalar_lea.vmem %s2933_s24, 512  ;;  %p2701_p12 = scmp.lt.s32.totalorder %s2933_s24, %s2933_s24 }
  0x1c   :  { %p2697_p11 = scmp.ne.s32.totalorder %s2933_s24, %s2696_s26  ;;  %p2702_p13 = scmp.lt.s32.totalorder %s2696_s26, %s2696_s26 }
  0x1e   :  { %p2703_p0 = por %p2702_p13, %p2701_p12 }
  0x20   :  { %p2704_p1 = pnand %p2703_p0, %p2697_p11 }
  0x22   :  { %2707 = shalt.err (!%p2704_p1)
}
  0x23   :  { %s2852_s1 = smov 128   ;;  %s2853_s22 = smov 8  }
  0x24   :  { %67 = dma.hbm_to_vmem [thread:$0]  %s3373_s5, 512, %s2933_s24, [#allocation9], %s2852_s1, %s2852_s1, %s2853_s22  }
  0x25   :  { %s2854_s29 = smov [#allocation11]   ;;  %s2855_s13 = smov [#allocation2]  }
  0x26   :  { %s91_s30 = sshll.u32 %s2854_s29, 4  ;;  %s28_s14 = sshll.u32 %s2855_s13, 4  ;;  %s92_s30 = int_to_ptr.vmem [resolvable:$true] %s91_s30  ;;  %s29_s14 = int_to_ptr.vmem [resolvable:$true] %s28_s14 }
  0x27   :  { %s2708_s17 = scalar_lea.hbm %s3378_s10, 1024 }
  0x28   :  { %p2709_p2 = scmp.ne.s32.totalorder %s3378_s10, %s2708_s17  ;;  %p2712_p3 = scmp.lt.u32.totalorder %s2708_s17, %s3378_s10 }
  0x2a   :  { %p2714_p4 = pnand %p2712_p3, %p2709_p2 }
  0x2c   :  { %2717 = shalt.err (!%p2714_p4)
}
  0x2d   :  { %s2718_s5 = scalar_lea.vmem %s92_s30, 1024  ;;  %p2723_p6 = scmp.lt.s32.totalorder %s92_s30, %s92_s30 }
  0x2e   :  { %p2719_p5 = scmp.ne.s32.totalorder %s92_s30, %s2718_s5  ;;  %p2724_p7 = scmp.lt.s32.totalorder %s2718_s5, %s2718_s5 }
  0x30   :  { %p2725_p8 = por %p2724_p7, %p2723_p6 }
  0x32   :  { %p2726_p9 = pnand %p2725_p8, %p2719_p5 }
  0x34   :  { %2729 = shalt.err (!%p2726_p9)
}
  0x35   :  { %97 = dma.hbm_to_vmem [thread:$0]  %s3378_s10, 1024, %s92_s30, [#allocation12], %s2852_s1, %s2852_s1, %s2853_s22  }
  0x36   :  { %s2730_s27 = scalar_lea.hbm %s3368_s0, 128 }
  0x37   :  { %p2731_p10 = scmp.ne.s32.totalorder %s3368_s0, %s2730_s27  ;;  %p2734_p11 = scmp.lt.u32.totalorder %s2730_s27, %s3368_s0 }
  0x39   :  { %p2736_p12 = pnand %p2734_p11, %p2731_p10 }
  0x3b   :  { %2739 = shalt.err (!%p2736_p12)
}
  0x3c   :  { %s2740_s16 = scalar_lea.vmem %s29_s14, 128  ;;  %p2745_p0 = scmp.lt.s32.totalorder %s29_s14, %s29_s14 }
  0x3d   :  { %p2741_p13 = scmp.ne.s32.totalorder %s29_s14, %s2740_s16  ;;  %p2746_p1 = scmp.lt.s32.totalorder %s2740_s16, %s2740_s16 }
  0x3f   :  { %p2747_p2 = por %p2746_p1, %p2745_p0 }
  0x41   :  { %p2748_p3 = pnand %p2747_p2, %p2741_p13 }
  0x43   :  { %2751 = shalt.err (!%p2748_p3)
}
  0x44   :  { %31 = dma.hbm_to_vmem [thread:$0]  %s3368_s0, 128, %s29_s14, [#allocation3]  }
  0x45   :  { %s2856_s17 = smov [#allocation7]   ;;  %s2857_s19 = smov [#allocation10]  }
  0x46   :  { %s48_s18 = sshll.u32 %s2856_s17, 4  ;;  %s79_s20 = sshll.u32 %s2857_s19, 4  ;;  %s49_s18 = int_to_ptr.vmem [resolvable:$true] %s48_s18  ;;  %s2994_s20 = int_to_ptr.vmem [resolvable:$true] %s79_s20 }
  0x47   :  { %s2752_s24 = scalar_lea.hbm %s3370_s2, 128 }
  0x48   :  { %p2753_p4 = scmp.ne.s32.totalorder %s3370_s2, %s2752_s24  ;;  %p2756_p5 = scmp.lt.u32.totalorder %s2752_s24, %s3370_s2 }
  0x4a   :  { %p2758_p6 = pnand %p2756_p5, %p2753_p4 }
  0x4c   :  { %2761 = shalt.err (!%p2758_p6)
}
  0x4d   :  { %s2762_s0 = scalar_lea.vmem %s49_s18, 128  ;;  %p2767_p8 = scmp.lt.s32.totalorder %s49_s18, %s49_s18 }
  0x4e   :  { %p2763_p7 = scmp.ne.s32.totalorder %s49_s18, %s2762_s0  ;;  %p2768_p9 = scmp.lt.s32.totalorder %s2762_s0, %s2762_s0 }
  0x50   :  { %p2769_p10 = por %p2768_p9, %p2767_p8 }
  0x52   :  { %p2770_p11 = pnand %p2769_p10, %p2763_p7 }
  0x54   :  { %2773 = shalt.err (!%p2770_p11)
}
  0x55   :  { %51 = dma.hbm_to_vmem [thread:$0]  %s3370_s2, 128, %s49_s18, [#allocation6]  }
  0x56   :  { %s2774_s15 = scalar_lea.hbm %s3377_s9, 1024 }
  0x57   :  { %p2775_p12 = scmp.ne.s32.totalorder %s3377_s9, %s2774_s15  ;;  %p2778_p13 = scmp.lt.u32.totalorder %s2774_s15, %s3377_s9 }
  0x59   :  { %p2780_p0 = pnand %p2778_p13, %p2775_p12 }
  0x5b   :  { %2783 = shalt.err (!%p2780_p0)
}
  0x5c   :  { %s2784_s19 = scalar_lea.vmem %s2994_s20, 1024  ;;  %p2789_p2 = scmp.lt.s32.totalorder %s2994_s20, %s2994_s20 }
  0x5d   :  { %p2785_p1 = scmp.ne.s32.totalorder %s2994_s20, %s2784_s19  ;;  %p2790_p3 = scmp.lt.s32.totalorder %s2784_s19, %s2784_s19 }
  0x5f   :  { %p2791_p4 = por %p2790_p3, %p2789_p2 }
  0x61   :  { %p2792_p5 = pnand %p2791_p4, %p2785_p1 }
  0x63   :  { %2795 = shalt.err (!%p2792_p5)
}
  0x64   :  { %85 = dma.hbm_to_vmem [thread:$0]  %s3377_s9, 1024, %s2994_s20, [#allocation9], %s2852_s1, %s2852_s1, %s2853_s22  }
  0x65   :  { %s2858_s21 = smov [#allocation13]   ;;  %s2796_s25 = scalar_lea.hbm %s3379_s11, 256 }
  0x66   :  { %s103_s5 = sshll.u32 %s2858_s21, 4  ;;  %p2797_p6 = scmp.ne.s32.totalorder %s3379_s11, %s2796_s25  ;;  %s104_s5 = int_to_ptr.vmem [resolvable:$true] %s103_s5 }
  0x67   :  { %p2800_p7 = scmp.lt.u32.totalorder %s2796_s25, %s3379_s11 }
  0x69   :  { %p2802_p8 = pnand %p2800_p7, %p2797_p6 }
  0x6b   :  { %2805 = shalt.err (!%p2802_p8)
}
  0x6c   :  { %s2806_s28 = scalar_lea.vmem %s104_s5, 256  ;;  %p2811_p10 = scmp.lt.s32.totalorder %s104_s5, %s104_s5 }
  0x6d   :  { %p2807_p9 = scmp.ne.s32.totalorder %s104_s5, %s2806_s28  ;;  %p2812_p11 = scmp.lt.s32.totalorder %s2806_s28, %s2806_s28 }
  0x6f   :  { %p2813_p12 = por %p2812_p11, %p2811_p10 }
  0x71   :  { %p2814_p13 = pnand %p2813_p12, %p2807_p9 }
  0x73   :  { %2817 = shalt.err (!%p2814_p13)
}
  0x74   :  { %109 = dma.hbm_to_vmem [thread:$0]  %s3379_s11, 256, %s104_s5, [#allocation12], %s2852_s1, %s2852_s1, %s2853_s22  }
  0x75   :  { %2840 = dma.done.wait [#allocation3], 128  }
  0x76   :  { %2841 = vsyncadd [#allocation3], 4294967168 }
  0x77   :  { %2842 = dma.done.wait [#allocation6], 256  }
  0x78   :  { %2843 = vsyncadd [#allocation6], 4294967040 }
  0x79   :  { %2844 = dma.done.wait [#allocation9], 1536  }
  0x7a   :  { %2845 = vsyncadd [#allocation9], 4294965760 }
  0x7b   :  { %2846 = dma.done.wait [#allocation12], 1280  }
  0x7c   :  { %2847 = vsyncadd [#allocation12], 4294966016  ;;  %v2859_v0 = vmov 0.0|0.0   ;;  %vm2860_vm0 = vmmov 0   ;;  %v2861_v1 = vmov 0.0   ;;  %v136_v2 = vld [vmem:[%s3371_s3 + $0x10] sm:$0xff] }
  0x7d   :  { %2528 = vmatprep.subr.bf16.mxu0 %v2859_v0  ;;  %2334 = vmatprep.mubr.msk.f32.mxu0 %vm2860_vm0, %v2861_v1  ;;  %v137_v3 = vld [vmem:[%s3371_s3 + $0x18] sm:$0xff]  ;;  %v138_v4 = vld [vmem:[%s3371_s3 + $0x20] sm:$0xff]  ;;  %v139_v6 = vld [vmem:[%s3371_s3 + $0x28] sm:$0xff]  ;;  %vm140_vm1 = vcmask 261120   ;;  %vm214_vm2 = vcmask 130048   ;;  %s2863_s18 = smov 96  }
  0x7e   :  { %2344 = vmatprep.subr.mxu1 %v2861_v1  ;;  %2346 = vmatprep.mubr.msk.f32.mxu1 %vm2860_vm0, %v2861_v1  ;;  %v2529_v5 = vpack.c.bf16 %v137_v3, %v136_v2  ;;  %v2532_v7 = vpack.c.bf16 %v139_v6, %v138_v4  ;;  %v134_v8 = vld [vmem:[%s3371_s3] sm:$0xff]  ;;  %v135_v9 = vld [vmem:[%s3371_s3 + $0x8] sm:$0xff]  ;;  %s2862_s3 = smov 80   ;;  %s2864_s21 = smov 112   ;;  %vm366_vm3 = vcmask 64512   ;;  %v133_v42 = vld [vmem:[#allocation7] sm:$0xff] }
  0x7f   :  { %v3068_v10 = vld [vmem:[#allocation5] sm:$0xff]  ;;  %v2535_v11 = vpack.c.bf16 %v135_v9, %v134_v8  ;;  %v131_v12 = vld [vmem:[#allocation2] sm:$0xff]  ;;  %s2865_s5 = smov 64   ;;  %s2866_s24 = smov 32   ;;  %v636_v43 = vsub.f32 0.0, %v133_v42 }
  0x80   :  { %2530 = vmatpush3.bf16.msra.mxu0 %v2529_v5  ;;  %v642_v47 = vld [vmem:[%s3372_s4] sm:$0xff]  ;;  %v643_v48 = vld [vmem:[%s3372_s4 + $0x8] sm:$0xff] }
  0x81   :  { %2531 = vmatprep.subr.bf16.mxu0 %v2859_v0  ;;  %v637_v44 = vmul.f32 1.442695, %v636_v43  ;;  %v2538_v49 = vpack.c.bf16 %v643_v48, %v642_v47  ;;  %v868_v43 = vld [vmem:[%s3374_s6 + $0x20] sm:$0xff]  ;;  %v871_v47 = vld [vmem:[%s3374_s6 + $0x38] sm:$0xff] }
  0x84   :  { %2533 = vmatpush3.bf16.msra.mxu0 %v2532_v7 }
  0x85   :  { %2534 = vmatprep.subr.bf16.mxu0 %v2859_v0 }
  0x87   :  { %2335 = vmatmul.mubr.msk.f32.vlgmr.msra.gmra.mrb[0].mxu0 %vm140_vm1, %v3068_v10 }
  0x88   :  { %2536 = vmatpush3.bf16.msra.mxu0 %v2535_v11  ;;  %2341 = vmatprep.mubr.msk.f32.mxu0 %vm2860_vm0, %v2861_v1 }
  0x89   :  { %2359 = vmatprep.subr.mxu0 %v2861_v1 }
  0x8f   :  { %2342 = vmatmul.mubr.msk.f32.vlgmr.msra.gmra.mrb[0].mxu0 %vm214_vm2, %v131_v12  ;;  %v717_v12 = vld [vmem:[#allocation8] sm:$0xff] }
  0x90   :  { %2361 = vmatprep.mubr.msk.f32.mxu0 %vm2860_vm0, %v2861_v1 }
 0x162   :  { %v284_v13 = vpop.f32.mrb[0].mxu0 }
 0x163   :  { %464 = vrot.lane.b32.xlu1 %v284_v13, %s2862_s3  ;;  %289 = vrot.lane.b32.xlu0 %v284_v13, %s2863_s18  ;;  %v2343_v14 = vpop.f32.mrb[1].mxu0 }
 0x167   :  { %462 = vrot.lane.b32.xlu1 %v284_v13, %s2864_s21  ;;  %386 = vrot.lane.b32.xlu0 %v284_v13, %s2865_s5 }
 0x16b   :  { %560 = vrot.lane.b32.xlu0 %v284_v13, %s2866_s24 }
 0x1d5   :  { %v290_v15 = vpop.permute.xlu0 %289  ;;  %v465_v39 = vpop.permute.xlu1 %464 }
 0x1d6   :  { %2345 = vmatpush3.xpose.msk.msra.mxu1 %vm214_vm2, %v290_v15 }
 0x1d7   :  { %2349 = vmatprep.subr.mxu1 %v2861_v1 }
 0x1d9   :  { %2347 = vmatmul.mubr.msk.f32.vlgmr.msra.gmra.mrb[0].mxu1 %vm214_vm2, %v284_v13  ;;  %v387_v16 = vpop.permute.xlu0 %386  ;;  %v463_v41 = vpop.permute.xlu1 %462  ;;  %v718_v13 = vld [vmem:[#allocation8 + $0x8] sm:$0xff] }
 0x1da   :  { %2350 = vmatpush3.msra.mxu1 %v387_v16  ;;  %2351 = vmatprep.mubr.msk.f32.mxu1 %vm2860_vm0, %v2861_v1  ;;  %v2541_v15 = vpack.c.bf16 %v718_v13, %v717_v12  ;;  %v1100_v12 = vld [vmem:[%s3376_s8] sm:$0xff]  ;;  %v1101_v13 = vld [vmem:[%s3376_s8 + $0x8] sm:$0xff] }
 0x1db   :  { %2354 = vmatprep.subr.mxu1 %v2861_v1 }
 0x1dd   :  { %v561_v17 = vpop.permute.xlu0 %560 }
 0x1de   :  { %2360 = vmatpush3.msra.mxu0 %v561_v17  ;;  %v719_v17 = vld [vmem:[#allocation8 + $0x10] sm:$0xff] }
 0x1df   :  { %2540 = vmatprep.subr.bf16.mxu0 %v2859_v0 }
 0x2ac   :  { %v361_v18 = vpop.f32.mrb[0].mxu1 }
 0x2ad   :  { %v365_v19 = vmul.f32 0.25, %v361_v18  ;;  %v2348_v20 = vpop.f32.mrb[1].mxu1  ;;  %v720_v18 = vld [vmem:[#allocation8 + $0x18] sm:$0xff] }
 0x2af   :  { %v367_v21 = vsel %vm366_vm3, %v365_v19, -inf }
 0x2b0   :  { %v368_v22 = vrot.slane %v367_v21, 4 }
 0x2b2   :  { %v369_v23 = vmax.f32 %v367_v21, %v368_v22 }
 0x2b4   :  { %v370_v24 = vrot.slane %v369_v23, 2 }
 0x2b6   :  { %v371_v25 = vmax.f32 %v369_v23, %v370_v24  ;;  %v864_v24 = vld [vmem:[%s3374_s6] sm:$0xff] }
 0x2b8   :  { %v372_v26 = vrot.slane %v371_v25, 1 }
 0x2ba   :  { %v373_v27 = vmax.f32 %v371_v25, %v372_v26  ;;  %v865_v25 = vld [vmem:[%s3374_s6 + $0x8] sm:$0xff] }
 0x2bb   :  { %v2547_v26 = vpack.c.bf16 %v865_v25, %v864_v24 }
 0x2bc   :  { %v374_v28 = vsub.f32 %v365_v19, %v373_v27  ;;  %v2544_v19 = vpack.c.bf16 %v720_v18, %v719_v17  ;;  %v1102_v17 = vld [vmem:[%s3376_s8 + $0x10] sm:$0xff]  ;;  %v1103_v18 = vld [vmem:[%s3376_s8 + $0x18] sm:$0xff] }
 0x2be   :  { %v375_v29 = vmul.f32 1.442695, %v374_v28  ;;  %v867_v28 = vld [vmem:[%s3374_s6 + $0x18] sm:$0xff] }
 0x2c0   :  { %2636 = vpow2.f32 %v375_v29 }
 0x2ca   :  { %v2637_v30 = vpop.eup %2636 }
 0x2cb   :  { %v377_v31 = vsel %vm366_vm3, %v2637_v30, 0.0 }
 0x2cc   :  { %v378_v32 = vrot.slane %v377_v31, 4 }
 0x2ce   :  { %v379_v33 = vadd.f32 %v378_v32, %v377_v31  ;;  %v872_v31 = vld [vmem:[%s3374_s6 + $0x40] sm:$0xff]  ;;  %v873_v32 = vld [vmem:[%s3374_s6 + $0x48] sm:$0xff] }
 0x2d0   :  { %v380_v34 = vrot.slane %v379_v33, 2 }
 0x2d2   :  { %v381_v35 = vadd.f32 %v380_v34, %v379_v33  ;;  %v2553_v33 = vpack.c.bf16 %v873_v32, %v872_v31  ;;  %v874_v34 = vld [vmem:[%s3374_s6 + $0x50] sm:$0xff] }
 0x2d4   :  { %v382_v36 = vrot.slane %v381_v35, 1 }
 0x2d6   :  { %v383_v37 = vadd.f32 %v382_v36, %v381_v35  ;;  %v875_v35 = vld [vmem:[%s3374_s6 + $0x58] sm:$0xff] }
 0x2d7   :  { %v2556_v36 = vpack.c.bf16 %v875_v35, %v874_v34  ;;  %v1105_v34 = vld [vmem:[#allocation10 + $0x8] sm:$0xff] }
 0x2d8   :  { %2638 = vrcp.f32 %v383_v37  ;;  %v1096_v37 = vld [vmem:[%s3375_s7] sm:$0xff] }
 0x2d9   :  { %2640 = vpow2.f32 %v637_v44  ;;  %v869_v44 = vld [vmem:[%s3374_s6 + $0x28] sm:$0xff] }
 0x2e2   :  { %v2639_v38 = vpop.eup %2638 }
 0x2e3   :  { %v385_v40 = vmul.f32 %v2639_v38, %v2637_v30  ;;  %v2641_v45 = vpop.eup %2640  ;;  %v1097_v38 = vld [vmem:[%s3375_s7 + $0x8] sm:$0xff] }
 0x2e4   :  { %v639_v46 = vadd.f32 1.0, %v2641_v45  ;;  %v2559_v45 = vpack.c.bf16 %v869_v44, %v868_v43 }
 0x2e5   :  { %2352 = vmatmul.mubr.msk.f32.vlgmr.msra.gmra.mrb[2].mxu1 %vm366_vm3, %v385_v40  ;;  %v2565_v40 = vpack.c.bf16 %v1097_v38, %v1096_v37  ;;  %v1107_v37 = vld [vmem:[#allocation10 + $0x18] sm:$0xff] }
 0x2e6   :  { %2355 = vmatpush3.xpose.msk.msra.mxu1 %vm214_vm2, %v465_v39  ;;  %2356 = vmatprep.mubr.msk.f32.mxu1 %vm2860_vm0, %v2861_v1  ;;  %2642 = vrcp.f32 %v639_v46  ;;  %v1098_v39 = vld [vmem:[%s3375_s7 + $0x10] sm:$0xff] }
 0x2e7   :  { %2537 = vmatprep.subr.bf16.mxu1 %v2859_v0  ;;  %v870_v46 = vld [vmem:[%s3374_s6 + $0x30] sm:$0xff] }
 0x2e9   :  { %2357 = vmatmul.mubr.msk.f32.vlgmr.msra.gmra.mrb[4].mxu1 %vm214_vm2, %v463_v41  ;;  %v1099_v41 = vld [vmem:[%s3375_s7 + $0x18] sm:$0xff] }
 0x2ea   :  { %2368 = vmatprep.mubr.msk.f32.mxu1 %vm2860_vm0, %v2861_v1  ;;  %2539 = vmatpush3.bf16.msra.mxu1 %v2538_v49  ;;  %v2568_v42 = vpack.c.bf16 %v1099_v41, %v1098_v39  ;;  %v1108_v39 = vld [vmem:[#allocation11] sm:$0xff] }
 0x2eb   :  { %2382 = vmatprep.subr.mxu1 %v2861_v1 }
 0x2f0   :  { %v2643_v50 = vpop.eup %2642 }
 0x2f1   :  { %2369 = vmatmul.mubr.msk.f32.vlgmr.msra.gmra.mrb[6].mxu1 %vm214_vm2, %v2643_v50  ;;  %v2562_v50 = vpack.c.bf16 %v871_v47, %v870_v46 }
 0x2f2   :  { %2384 = vmatprep.mubr.msk.f32.mxu1 %vm2860_vm0, %v2861_v1 }
 0x3b8   :  { %v3108_v51 = vpop.f32.mrb[2].mxu1 }
 0x3b9   :  { %v2353_v52 = vpop.f32.mrb[3].mxu1 }
 0x3bc   :  { %v536_v53 = vpop.f32.mrb[4].mxu1 }
 0x3bd   :  { %v540_v54 = vmul.f32 0.25, %v536_v53  ;;  %v2358_v55 = vpop.f32.mrb[5].mxu1  ;;  %v1113_v53 = vlaneseq }
 0x3bf   :  { %v541_v56 = vsel %vm366_vm3, %v540_v54, -inf }
 0x3c0   :  { %v542_v57 = vrot.slane %v541_v56, 4 }
 0x3c2   :  { %v543_v58 = vmax.f32 %v541_v56, %v542_v57  ;;  %v3197_v56 = vld [vmem:[#allocation13] sm:$0xff] }
 0x3c4   :  { %v544_v59 = vrot.slane %v543_v58, 2  ;;  %v713_v20 = vpop.f32.mrb[6].mxu1 }
 0x3c5   :  { %v2370_v21 = vpop.f32.mrb[7].mxu1 }
 0x3c6   :  { %v545_v60 = vmax.f32 %v543_v58, %v544_v59 }
 0x3c8   :  { %v546_v61 = vrot.slane %v545_v60, 1 }
 0x3ca   :  { %v547_v62 = vmax.f32 %v545_v60, %v546_v61 }
 0x3cc   :  { %v548_v63 = vsub.f32 %v540_v54, %v547_v62  ;;  %v3194_v54 = vshrl.u32 %v1113_v53, 7  ;;  %v1110_v53 = vld [vmem:[#allocation11 + $0x10] sm:$0xff] }
 0x3ce   :  { %v549_v2 = vmul.f32 1.442695, %v548_v63  ;;  %v1115_v55 = vsub.s32 0, %v3194_v54  ;;  %v1454_v46 = vsub.s32 5, %v3194_v54 }
 0x3d0   :  { %2644 = vpow2.f32 %v549_v2  ;;  %v1116_v57 = vrot.slane %v3197_v56, %v1115_v55 }
 0x3da   :  { %v2645_v3 = vpop.eup %2644 }
 0x3db   :  { %v551_v4 = vsel %vm366_vm3, %v2645_v3, 0.0 }
 0x3dc   :  { %v552_v5 = vrot.slane %v551_v4, 4 }
 0x3de   :  { %v553_v6 = vadd.f32 %v552_v5, %v551_v4 }
 0x3e0   :  { %v554_v7 = vrot.slane %v553_v6, 2 }
 0x3e2   :  { %v555_v8 = vadd.f32 %v554_v7, %v553_v6 }
 0x3e4   :  { %v556_v9 = vrot.slane %v555_v8, 1 }
 0x3e6   :  { %v557_v11 = vadd.f32 %v556_v9, %v555_v8 }
 0x3e8   :  { %2646 = vrcp.f32 %v557_v11 }
 0x3f2   :  { %v2647_v14 = vpop.eup %2646 }
 0x3f3   :  { %v559_v16 = vmul.f32 %v2647_v14, %v2645_v3 }
 0x3f5   :  { %2362 = vmatmul.mubr.msk.f32.vlgmr.msra.gmra.mrb[2].mxu0 %vm366_vm3, %v559_v16 }
 0x3f6   :  { %2542 = vmatpush3.bf16.msra.mxu0 %v2541_v15  ;;  %2379 = vmatprep.mubr.msk.f32.mxu0 %vm2860_vm0, %v2861_v1  ;;  %v2571_v15 = vpack.c.bf16 %v1101_v13, %v1100_v12 }
 0x3f7   :  { %2543 = vmatprep.subr.bf16.mxu0 %v2859_v0 }
 0x3fa   :  { %2545 = vmatpush3.bf16.msra.mxu0 %v2544_v19  ;;  %v2574_v19 = vpack.c.bf16 %v1103_v18, %v1102_v17  ;;  %v2223_v17 = vld [vmem:[%s3375_s7 + $0x28] sm:$0xff] }
 0x3fb   :  { %2564 = vmatprep.subr.bf16.mxu0 %v2859_v0 }
 0x3fd   :  { %2380 = vmatmul.mubr.msk.f32.vlgmr.msra.gmra.mrb[4].mxu0 %vm140_vm1, %v3068_v10  ;;  %v866_v10 = vld [vmem:[%s3374_s6 + $0x10] sm:$0xff] }
 0x3fe   :  { %2428 = vmatprep.mubr.msk.f32.mxu0 %vm2860_vm0, %v2861_v1  ;;  %v2550_v30 = vpack.c.bf16 %v867_v28, %v866_v10  ;;  %2566 = vmatpush3.bf16.msra.mxu0 %v2565_v40  ;;  %v1109_v40 = vld [vmem:[#allocation11 + $0x8] sm:$0xff] }
 0x3ff   :  { %2567 = vmatprep.subr.bf16.mxu0 %v2859_v0  ;;  %v2583_v41 = vpack.c.bf16 %v1109_v40, %v1108_v39 }
 0x402   :  { %2569 = vmatpush3.bf16.msra.mxu0 %v2568_v42 }
 0x403   :  { %2431 = vmatprep.subr.mxu0 %v2861_v1 }
 0x4c8   :  { %v632_v22 = vpop.f32.mrb[2].mxu0 }
 0x4c9   :  { %v2363_v23 = vpop.f32.mrb[3].mxu0 }
 0x4d0   :  { %v787_v27 = vpop.f32.mrb[4].mxu0 }
 0x4d1   :  { %v2381_v29 = vpop.f32.mrb[5].mxu0  ;;  %2383 = vmatpush3.msra.mxu1 %v787_v27 }
 0x4d2   :  { %2385 = vmatmul.mubr.msk.f32.vlgmr.msra.gmra.mrb[8].mxu1 %vm366_vm3, %v713_v20  ;;  %2546 = vmatprep.subr.bf16.mxu1 %v2859_v0 }
 0x4d3   :  { %2548 = vmatpush3.bf16.msra.mxu1 %v2547_v26  ;;  %2395 = vmatprep.mubr.msk.f32.mxu1 %vm2860_vm0, %v2861_v1 }
 0x4d4   :  { %2549 = vmatprep.subr.bf16.mxu1 %v2859_v0 }
 0x4d7   :  { %2551 = vmatpush3.bf16.msra.mxu1 %v2550_v30 }
 0x4d8   :  { %2552 = vmatprep.subr.bf16.mxu1 %v2859_v0 }
 0x4da   :  { %2396 = vmatmul.mubr.msk.f32.vlgmr.msra.gmra.mrb[10].mxu1 %vm140_vm1, %v3108_v51 }
 0x4db   :  { %2554 = vmatpush3.bf16.msra.mxu1 %v2553_v33  ;;  %2406 = vmatprep.mubr.msk.f32.mxu1 %vm2860_vm0, %v2861_v1  ;;  %v1104_v33 = vld [vmem:[#allocation10] sm:$0xff] }
 0x4dc   :  { %2555 = vmatprep.subr.bf16.mxu1 %v2859_v0  ;;  %v2577_v35 = vpack.c.bf16 %v1105_v34, %v1104_v33  ;;  %v3291_v33 = vld [vmem:[#allocation13 + $0x8] sm:$0xff] }
 0x4dd   :  { %v1662_v34 = vrot.slane %v3291_v33, %v1115_v55 }
 0x4df   :  { %2557 = vmatpush3.bf16.msra.mxu1 %v2556_v36  ;;  %v1106_v36 = vld [vmem:[#allocation10 + $0x10] sm:$0xff] }
 0x4e0   :  { %2558 = vmatprep.subr.bf16.mxu1 %v2859_v0  ;;  %v2580_v38 = vpack.c.bf16 %v1107_v37, %v1106_v36 }
 0x5a5   :  { %v860_v48 = vpop.f32.mrb[8].mxu1 }
 0x5a6   :  { %2407 = vmatmul.mubr.msk.f32.vlgmr.msra.gmra.mrb[10].mxu1 %vm140_vm1, %v860_v48  ;;  %v2386_v49 = vpop.f32.mrb[9].mxu1 }
 0x5a7   :  { %2560 = vmatpush3.bf16.msra.mxu1 %v2559_v45  ;;  %2417 = vmatprep.mubr.msk.f32.mxu1 %vm2860_vm0, %v2861_v1  ;;  %v1449_v45 = vsub.s32 4, %v3194_v54 }
 0x5a8   :  { %2561 = vmatprep.subr.bf16.mxu1 %v2859_v0 }
 0x5a9   :  { %v1450_v47 = vrot.slane %v3197_v56, %v1449_v45 }
 0x5ab   :  { %2563 = vmatpush3.bf16.msra.mxu1 %v2562_v50  ;;  %v1455_v50 = vrot.slane %v3197_v56, %v1454_v46 }
 0x5ac   :  { %2576 = vmatprep.subr.bf16.mxu1 %v2859_v0 }
 0x5ae   :  { %2418 = vmatmul.mubr.msk.f32.vlgmr.msra.gmra.mrb[10].mxu1 %vm140_vm1, %v632_v22  ;;  %v1357_v22 = vsub.s32 1, %v3194_v54 }
 0x5af   :  { %2460 = vmatprep.mubr.msk.f32.mxu1 %vm2860_vm0, %v2861_v1  ;;  %2578 = vmatpush3.bf16.msra.mxu1 %v2577_v35 }
 0x5b0   :  { %v1358_v23 = vrot.slane %v3197_v56, %v1357_v22  ;;  %2579 = vmatprep.subr.bf16.mxu1 %v2859_v0 }
 0x5b3   :  { %2581 = vmatpush3.bf16.msra.mxu1 %v2580_v38 }
 0x5b4   :  { %2588 = vmatprep.subr.bf16.mxu1 %v2859_v0 }
 0x681   :  { %v1091_v51 = vpop.f32.mrb[10].mxu1 }
 0x682   :  { %v2419_v52 = vpop.f32.mrb[11].mxu1  ;;  %2429 = vmatmul.mubr.msk.f32.vlgmr.msra.gmra.mrb[6].mxu0 %vm140_vm1, %v1091_v51 }
 0x683   :  { %2433 = vmatprep.mubr.msk.f32.mxu0 %vm2860_vm0, %v2861_v1 }
 0x755   :  { %v1186_v58 = vpop.f32.mrb[6].mxu0 }
 0x756   :  { %v1187_v59 = vadd.f32 %v1186_v58, %v1116_v57  ;;  %v2430_v60 = vpop.f32.mrb[7].mxu0  ;;  %v1111_v57 = vld [vmem:[#allocation11 + $0x18] sm:$0xff] }
 0x757   :  { %v2586_v58 = vpack.c.bf16 %v1111_v57, %v1110_v53  ;;  %v2229_v53 = vld [vmem:[%s3376_s8 + $0x38] sm:$0xff] }
 0x758   :  { %1191 = vrot.lane.b32.xlu1 %v1187_v59, %s2863_s18 }
 0x7ca   :  { %v1192_v61 = vpop.permute.xlu1 %1191 }
 0x7cb   :  { %2432 = vmatpush3.xpose.msk.msra.mxu0 %vm140_vm1, %v1192_v61 }
 0x7cc   :  { %2436 = vmatprep.subr.mxu0 %v2861_v1 }
 0x7ce   :  { %2434 = vmatmul.mubr.msk.f32.vlgmr.msra.gmra.mrb[8].mxu0 %vm140_vm1, %v1187_v59 }
 0x7cf   :  { %2438 = vmatprep.mubr.msk.f32.mxu0 %vm2860_vm0, %v2861_v1 }
 0x8a1   :  { %v1263_v62 = vpop.f32.mrb[8].mxu0 }
 0x8a2   :  { %v1267_v63 = vmul.f32 0.17677669, %v1263_v62  ;;  %v2435_v2 = vpop.f32.mrb[9].mxu0 }
 0x8a4   :  { %v1268_v3 = vsel %vm366_vm3, %v1267_v63, -inf }
 0x8a5   :  { %1269 = vmax.xlane.f32.xlu0 %v1268_v3  ;;  %v1611_v3 = vsub.s32 3, %v3194_v54 }
 0x8bb   :  { %1279 = vrot.lane.b32.xlu0 %v1187_v59, %s2865_s5  ;;  %v1459_v59 = vsub.s32 2, %v3194_v54 }
 0x8bd   :  { %v1460_v60 = vrot.slane %v3197_v56, %v1459_v59 }
 0x932   :  { %v1270_v4 = vpop.xlane.xlu0 %1269 }
 0x933   :  { %v1271_v5 = vsub.f32 %v1267_v63, %v1270_v4  ;;  %v1612_v4 = vrot.slane %v3197_v56, %v1611_v3 }
 0x935   :  { %v1272_v6 = vmul.f32 1.442695, %v1271_v5 }
 0x936   :  { %v1280_v7 = vpop.permute.xlu0 %1279 }
 0x937   :  { %2648 = vpow2.f32 %v1272_v6  ;;  %2437 = vmatpush3.msra.mxu0 %v1280_v7 }
 0x938   :  { %2570 = vmatprep.subr.bf16.mxu0 %v2859_v0 }
 0x941   :  { %v2649_v8 = vpop.eup %2648 }
 0x942   :  { %v1274_v9 = vsel %vm366_vm3, %v2649_v8, 0.0 }
 0x943   :  { %1275 = vadd.xlane.f32.xlu1 %v1274_v9 }
 0x9d0   :  { %v1276_v11 = vpop.xlane.xlu1 %1275 }
 0x9d1   :  { %2650 = vrcp.f32 %v1276_v11 }
 0x9db   :  { %v2651_v14 = vpop.eup %2650 }
 0x9dc   :  { %v1278_v16 = vmul.f32 %v2651_v14, %v2649_v8 }
 0x9de   :  { %2439 = vmatmul.mubr.msk.f32.vlgmr.msra.gmra.mrb[10].mxu0 %vm366_vm3, %v1278_v16  ;;  %v2222_v16 = vld [vmem:[%s3375_s7 + $0x20] sm:$0xff] }
 0x9df   :  { %2572 = vmatpush3.bf16.msra.mxu0 %v2571_v15  ;;  %2449 = vmatprep.mubr.msk.f32.mxu0 %vm2860_vm0, %v2861_v1  ;;  %v2589_v18 = vpack.c.bf16 %v2223_v17, %v2222_v16  ;;  %v1651_v17 = vld [vmem:[#allocation10 + $0x38] sm:$0xff] }
 0x9e0   :  { %2573 = vmatprep.subr.bf16.mxu0 %v2859_v0 }
 0x9e3   :  { %2575 = vmatpush3.bf16.msra.mxu0 %v2574_v19  ;;  %v2224_v19 = vld [vmem:[%s3375_s7 + $0x30] sm:$0xff] }
 0x9e4   :  { %2582 = vmatprep.subr.bf16.mxu0 %v2859_v0 }
 0xab1   :  { %v1351_v20 = vpop.f32.mrb[10].mxu0 }
 0xab2   :  { %v2440_v21 = vpop.f32.mrb[11].mxu0  ;;  %2450 = vmatmul.mubr.msk.f32.vlgmr.msra.gmra.mrb[12].mxu0 %vm140_vm1, %v1351_v20  ;;  %v2225_v20 = vld [vmem:[%s3375_s7 + $0x38] sm:$0xff] }
 0xab3   :  { %2471 = vmatprep.mubr.msk.f32.mxu0 %vm2860_vm0, %v2861_v1  ;;  %2584 = vmatpush3.bf16.msra.mxu0 %v2583_v41  ;;  %v2592_v21 = vpack.c.bf16 %v2225_v20, %v2224_v19  ;;  %v1653_v19 = vld [vmem:[#allocation11 + $0x20] sm:$0xff]  ;;  %v1654_v20 = vld [vmem:[#allocation11 + $0x28] sm:$0xff] }
 0xab4   :  { %2585 = vmatprep.subr.bf16.mxu0 %v2859_v0 }
 0xab7   :  { %2587 = vmatpush3.bf16.msra.mxu0 %v2586_v58 }
 0xab8   :  { %2485 = vmatprep.subr.mxu0 %v2861_v1 }
 0xb85   :  { %v1428_v24 = vpop.f32.mrb[12].mxu0 }
 0xb86   :  { %v1429_v25 = vadd.f32 %v1428_v24, %v1358_v23  ;;  %v2451_v26 = vpop.f32.mrb[13].mxu0 }
 0xb87   :  { %v1629_v26 = vsub.s32 6, %v3194_v54 }
 0xb88   :  { %v1432_v27 = vadd.f32 %v1429_v25, %v1091_v51 }
 0xb8a   :  { %v1433_v10 = vsel %vm140_vm1, %v1432_v27, 0.0 }
 0xb8b   :  { %1434 = vadd.xlane.f32.xlu1 %v1433_v10  ;;  %v1630_v10 = vrot.slane %v3197_v56, %v1629_v26 }
 0xc18   :  { %v1435_v28 = vpop.xlane.xlu1 %1434 }
 0xc19   :  { %v1437_v29 = vmul.f32 0.03125, %v1435_v28 }
 0xc1b   :  { %v1438_v30 = vsub.f32 %v1432_v27, %v1437_v29  ;;  %v1634_v27 = vsub.s32 7, %v3194_v54 }
 0xc1d   :  { %v1439_v31 = vmul.f32 %v1438_v30, %v1438_v30 }
 0xc1f   :  { %v1440_v32 = vsel %vm140_vm1, %v1439_v31, 0.0 }
 0xc20   :  { %1441 = vadd.xlane.f32.xlu1 %v1440_v32 }
 0xcad   :  { %v1442_v42 = vpop.xlane.xlu1 %1441 }
 0xcae   :  { %v1443_v43 = vmul.f32 0.03125, %v1442_v42 }
 0xcb0   :  { %v1444_v44 = vadd.f32 1e-05, %v1443_v43 }
 0xcb2   :  { %2652 = vrsqrt.f32 %v1444_v44 }
 0xcbc   :  { %v2653_v48 = vpop.eup %2652 }
 0xcbd   :  { %v1446_v49 = vmul.f32 %v2653_v48, %v1438_v30  ;;  %v1635_v30 = vrot.slane %v3197_v56, %v1634_v27 }
 0xcbf   :  { %v1451_v51 = vmul.f32 %v1450_v47, %v1446_v49  ;;  %v2226_v49 = vld [vmem:[%s3376_s8 + $0x20] sm:$0xff] }
 0xcc1   :  { %v1456_v52 = vadd.f32 %v1455_v50, %v1451_v51  ;;  %v2227_v50 = vld [vmem:[%s3376_s8 + $0x28] sm:$0xff]  ;;  %v2228_v51 = vld [vmem:[%s3376_s8 + $0x30] sm:$0xff]  ;;  %s2867_s8 = smov [#allocation14]  }
 0xcc2   :  { %v2598_v57 = vpack.c.bf16 %v2229_v53, %v2228_v51  ;;  %s2189_s14 = sshll.u32 %s2867_s8, 4  ;;  %s2190_s14 = int_to_ptr.vmem [resolvable:$true] %s2189_s14 }
 0xcc3   :  { %2461 = vmatmul.mubr.msk.f32.vlgmr.msra.gmra.mrb[12].mxu1 %vm140_vm1, %v1456_v52  ;;  %s2818_s28 = scalar_lea.vmem %s2190_s14, 128  ;;  %p2823_p1 = scmp.lt.s32.totalorder %s2190_s14, %s2190_s14 }
 0xcc4   :  { %2482 = vmatprep.mubr.msk.f32.mxu1 %vm2860_vm0, %v2861_v1  ;;  %2590 = vmatpush3.bf16.msra.mxu1 %v2589_v18  ;;  %p2819_p0 = scmp.ne.s32.totalorder %s2190_s14, %s2818_s28  ;;  %p2824_p2 = scmp.lt.s32.totalorder %s2818_s28, %s2818_s28 }
 0xcc5   :  { %2591 = vmatprep.subr.bf16.mxu1 %v2859_v0 }
 0xcc6   :  { %p2825_p3 = por %p2824_p2, %p2823_p1 }
 0xcc8   :  { %2593 = vmatpush3.bf16.msra.mxu1 %v2592_v21  ;;  %v2607_v21 = vpack.c.bf16 %v1654_v20, %v1653_v19  ;;  %p2826_p4 = pnand %p2825_p3, %p2819_p0 }
 0xcc9   :  { %2594 = vmatprep.subr.bf16.mxu1 %v2859_v0 }
 0xd96   :  { %v1530_v61 = vpop.f32.mrb[12].mxu1 }
 0xd97   :  { %v1531_v62 = vadd.f32 %v1530_v61, %v1460_v60  ;;  %v2462_v63 = vpop.f32.mrb[13].mxu1 }
 0xd99   :  { %v1534_v2 = vmax.f32 %v1531_v62, 0.0 }
 0xd9b   :  { %2472 = vmatmul.mubr.msk.f32.vlgmr.msra.gmra.mrb[14].mxu0 %vm140_vm1, %v1534_v2  ;;  %v1904_v2 = vrot.slane %v3291_v33, %v1357_v22  ;;  %v1650_v22 = vld [vmem:[#allocation10 + $0x30] sm:$0xff] }
 0xd9c   :  { %2487 = vmatprep.mubr.msk.f32.mxu0 %vm2860_vm0, %v2861_v1  ;;  %v2604_v18 = vpack.c.bf16 %v1651_v17, %v1650_v22 }
 0xe6e   :  { %v1604_v5 = vpop.f32.mrb[14].mxu0 }
 0xe6f   :  { %v1608_v6 = vadd.f32 %v1604_v5, %v1456_v52  ;;  %v2473_v7 = vpop.f32.mrb[15].mxu0  ;;  %v2595_v52 = vpack.c.bf16 %v2227_v50, %v2226_v49 }
 0xe71   :  { %v1613_v8 = vadd.f32 %v1612_v4, %v1608_v6 }
 0xe73   :  { %v1614_v9 = vsel %vm140_vm1, %v1613_v8, 0.0 }
 0xe74   :  { %1615 = vadd.xlane.f32.xlu1 %v1614_v9 }
 0xf01   :  { %v1616_v11 = vpop.xlane.xlu1 %1615 }
 0xf02   :  { %v1617_v12 = vmul.f32 0.03125, %v1616_v11 }
 0xf04   :  { %v1618_v13 = vsub.f32 %v1613_v8, %v1617_v12 }
 0xf06   :  { %v1619_v14 = vmul.f32 %v1618_v13, %v1618_v13 }
 0xf08   :  { %v1620_v15 = vsel %vm140_vm1, %v1619_v14, 0.0 }
 0xf09   :  { %1621 = vadd.xlane.f32.xlu1 %v1620_v15  ;;  %v1648_v15 = vld [vmem:[#allocation10 + $0x20] sm:$0xff] }
 0xf96   :  { %v1622_v23 = vpop.xlane.xlu1 %1621 }
 0xf97   :  { %v1623_v24 = vmul.f32 0.03125, %v1622_v23 }
 0xf99   :  { %v1624_v25 = vadd.f32 1e-05, %v1623_v24 }
 0xf9b   :  { %2654 = vrsqrt.f32 %v1624_v25 }
 0xfa5   :  { %v2655_v28 = vpop.eup %2654 }
 0xfa6   :  { %v1626_v29 = vmul.f32 %v2655_v28, %v1618_v13 }
 0xfa8   :  { %v1631_v31 = vmul.f32 %v1630_v10, %v1626_v29  ;;  %v1995_v10 = vrot.slane %v3291_v33, %v1449_v45 }
 0xfaa   :  { %v1636_v32 = vadd.f32 %v1635_v30, %v1631_v31  ;;  %v2000_v30 = vrot.slane %v3291_v33, %v1454_v46  ;;  %v2157_v46 = vrot.slane %v3291_v33, %v1611_v3  ;;  %v2175_v3 = vrot.slane %v3291_v33, %v1629_v26 }
 0xfac   :  { %2483 = vmatmul.mubr.msk.f32.vlgmr.msra.gmra.mrb[14].mxu1 %vm140_vm1, %v1636_v32 }
 0xfad   :  { %2503 = vmatprep.mubr.msk.f32.mxu1 %vm2860_vm0, %v2861_v1  ;;  %2596 = vmatpush3.bf16.msra.mxu1 %v2595_v52 }
 0xfae   :  { %2597 = vmatprep.subr.bf16.mxu1 %v2859_v0 }
 0xfb1   :  { %2599 = vmatpush3.bf16.msra.mxu1 %v2598_v57  ;;  %v2180_v57 = vrot.slane %v3291_v33, %v1634_v27 }
 0xfb2   :  { %2606 = vmatprep.subr.bf16.mxu1 %v2859_v0 }
0x107f   :  { %v1732_v35 = vpop.f32.mrb[14].mxu1 }
0x1080   :  { %v1733_v36 = vadd.f32 %v1732_v35, %v1662_v34  ;;  %v2484_v37 = vpop.f32.mrb[15].mxu1  ;;  %v1655_v34 = vld [vmem:[#allocation11 + $0x30] sm:$0xff] }
0x1082   :  { %1737 = vrot.lane.b32.xlu1 %v1733_v36, %s2863_s18 }
0x10f4   :  { %v1738_v38 = vpop.permute.xlu1 %1737 }
0x10f5   :  { %2486 = vmatpush3.xpose.msk.msra.mxu0 %vm140_vm1, %v1738_v38 }
0x10f6   :  { %2490 = vmatprep.subr.mxu0 %v2861_v1 }
0x10f8   :  { %2488 = vmatmul.mubr.msk.f32.vlgmr.msra.gmra.mrb[16].mxu0 %vm140_vm1, %v1733_v36 }
0x10f9   :  { %2492 = vmatprep.mubr.msk.f32.mxu0 %vm2860_vm0, %v2861_v1 }
0x11cb   :  { %v1809_v56 = vpop.f32.mrb[16].mxu0 }
0x11cc   :  { %v1813_v39 = vmul.f32 0.17677669, %v1809_v56  ;;  %v2489_v40 = vpop.f32.mrb[17].mxu0 }
0x11ce   :  { %v1814_v55 = vsel %vm366_vm3, %v1813_v39, -inf }
0x11cf   :  { %1815 = vmax.xlane.f32.xlu0 %v1814_v55 }
0x11e5   :  { %1825 = vrot.lane.b32.xlu0 %v1733_v36, %s2865_s5  ;;  %v2005_v36 = vrot.slane %v3291_v33, %v1459_v59 }
0x125c   :  { %v1816_v41 = vpop.xlane.xlu0 %1815 }
0x125d   :  { %v1817_v42 = vsub.f32 %v1813_v39, %v1816_v41 }
0x125f   :  { %v1818_v43 = vmul.f32 1.442695, %v1817_v42 }
0x1260   :  { %v1826_v44 = vpop.permute.xlu0 %1825 }
0x1261   :  { %2656 = vpow2.f32 %v1818_v43  ;;  %2491 = vmatpush3.msra.mxu0 %v1826_v44 }
0x1262   :  { %2600 = vmatprep.subr.bf16.mxu0 %v2859_v0 }
0x126b   :  { %v2657_v47 = vpop.eup %2656 }
0x126c   :  { %v1820_v48 = vsel %vm366_vm3, %v2657_v47, 0.0 }
0x126d   :  { %1821 = vadd.xlane.f32.xlu1 %v1820_v48 }
0x12fa   :  { %v1822_v58 = vpop.xlane.xlu1 %1821 }
0x12fb   :  { %2658 = vrcp.f32 %v1822_v58 }
0x1305   :  { %v2659_v60 = vpop.eup %2658 }
0x1306   :  { %v1824_v61 = vmul.f32 %v2659_v60, %v2657_v47 }
0x1308   :  { %2493 = vmatmul.mubr.msk.f32.vlgmr.msra.gmra.mrb[18].mxu0 %vm366_vm3, %v1824_v61 }
0x1309   :  { %2514 = vmatprep.mubr.msk.f32.mxu0 %vm2860_vm0, %v2861_v1 }
0x13db   :  { %v1897_v62 = vpop.f32.mrb[18].mxu0 }
0x13dc   :  { %v2494_v63 = vpop.f32.mrb[19].mxu0  ;;  %2504 = vmatmul.mubr.msk.f32.vlgmr.msra.gmra.mrb[16].mxu1 %vm140_vm1, %v1897_v62 }
0x13dd   :  { %2525 = vmatprep.mubr.msk.f32.mxu1 %vm2860_vm0, %v2861_v1  ;;  %v1649_v1 = vld [vmem:[#allocation10 + $0x28] sm:$0xff]  ;;  %2608 = vmatpush3.bf16.msra.mxu1 %v2607_v21 }
0x13de   :  { %v2601_v16 = vpack.c.bf16 %v1649_v1, %v1648_v15  ;;  %2609 = vmatprep.subr.bf16.mxu1 %v2859_v0 }
0x13e0   :  { %2602 = vmatpush3.bf16.msra.mxu0 %v2601_v16 }
0x13e1   :  { %2603 = vmatprep.subr.bf16.mxu0 %v2859_v0  ;;  %v1656_v0 = vld [vmem:[#allocation11 + $0x38] sm:$0xff] }
0x13e2   :  { %v2610_v35 = vpack.c.bf16 %v1656_v0, %v1655_v34 }
0x13e4   :  { %2605 = vmatpush3.bf16.msra.mxu0 %v2604_v18  ;;  %2611 = vmatpush3.bf16.msra.mxu1 %v2610_v35 }
0x14af   :  { %v1974_v4 = vpop.f32.mrb[16].mxu1 }
0x14b0   :  { %v1975_v5 = vadd.f32 %v1974_v4, %v1904_v2  ;;  %v2505_v6 = vpop.f32.mrb[17].mxu1 }
0x14b2   :  { %v1978_v7 = vadd.f32 %v1975_v5, %v1636_v32 }
0x14b4   :  { %v1979_v8 = vsel %vm140_vm1, %v1978_v7, 0.0 }
0x14b5   :  { %1980 = vadd.xlane.f32.xlu1 %v1979_v8 }
0x1542   :  { %v1981_v9 = vpop.xlane.xlu1 %1980 }
0x1543   :  { %v1982_v11 = vmul.f32 0.03125, %v1981_v9 }
0x1545   :  { %v1983_v12 = vsub.f32 %v1978_v7, %v1982_v11 }
0x1547   :  { %v1984_v13 = vmul.f32 %v1983_v12, %v1983_v12 }
0x1549   :  { %v1985_v14 = vsel %vm140_vm1, %v1984_v13, 0.0 }
0x154a   :  { %1986 = vadd.xlane.f32.xlu0 %v1985_v14 }
0x15d7   :  { %v1987_v23 = vpop.xlane.xlu0 %1986 }
0x15d8   :  { %v1988_v24 = vmul.f32 0.03125, %v1987_v23 }
0x15da   :  { %v1989_v25 = vadd.f32 1e-05, %v1988_v24 }
0x15dc   :  { %2660 = vrsqrt.f32 %v1989_v25 }
0x15e6   :  { %v2661_v28 = vpop.eup %2660 }
0x15e7   :  { %v1991_v29 = vmul.f32 %v2661_v28, %v1983_v12 }
0x15e9   :  { %v1996_v31 = vmul.f32 %v1995_v10, %v1991_v29 }
0x15eb   :  { %v2001_v32 = vadd.f32 %v2000_v30, %v1996_v31 }
0x15ed   :  { %2515 = vmatmul.mubr.msk.f32.vlgmr.msra.gmra.mrb[20].mxu0 %vm140_vm1, %v2001_v32 }
0x16c0   :  { %v2075_v37 = vpop.f32.mrb[20].mxu0 }
0x16c1   :  { %v2076_v45 = vadd.f32 %v2075_v37, %v2005_v36  ;;  %v2516_v38 = vpop.f32.mrb[21].mxu0 }
0x16c3   :  { %v2079_v56 = vmax.f32 %v2076_v45, 0.0 }
0x16c5   :  { %2526 = vmatmul.mubr.msk.f32.vlgmr.msra.gmra.mrb[18].mxu1 %vm140_vm1, %v2079_v56 }
0x1798   :  { %v2149_v39 = vpop.f32.mrb[18].mxu1 }
0x1799   :  { %v2153_v40 = vadd.f32 %v2149_v39, %v2001_v32  ;;  %v2527_v55 = vpop.f32.mrb[19].mxu1 }
0x179b   :  { %v2158_v41 = vadd.f32 %v2157_v46, %v2153_v40 }
0x179d   :  { %v2159_v42 = vsel %vm140_vm1, %v2158_v41, 0.0 }
0x179e   :  { %2160 = vadd.xlane.f32.xlu1 %v2159_v42 }
0x182b   :  { %v2161_v43 = vpop.xlane.xlu1 %2160 }
0x182c   :  { %v2162_v44 = vmul.f32 0.03125, %v2161_v43 }
0x182e   :  { %v2163_v59 = vsub.f32 %v2158_v41, %v2162_v44 }
0x1830   :  { %v2164_v47 = vmul.f32 %v2163_v59, %v2163_v59 }
0x1832   :  { %v2165_v48 = vsel %vm140_vm1, %v2164_v47, 0.0 }
0x1833   :  { %2166 = vadd.xlane.f32.xlu1 %v2165_v48 }
0x18c0   :  { %v2167_v49 = vpop.xlane.xlu1 %2166 }
0x18c1   :  { %v2168_v50 = vmul.f32 0.03125, %v2167_v49 }
0x18c3   :  { %v2169_v51 = vadd.f32 1e-05, %v2168_v50 }
0x18c5   :  { %2662 = vrsqrt.f32 %v2169_v51 }
0x18cf   :  { %v2663_v52 = vpop.eup %2662 }
0x18d0   :  { %v2171_v53 = vmul.f32 %v2663_v52, %v2163_v59 }
0x18d2   :  { %v2176_v58 = vmul.f32 %v2175_v3, %v2171_v53 }
0x18d4   :  { %v2181_v60 = vadd.f32 %v2180_v57, %v2176_v58 }
0x18d6   :  { %2182 = vst.msk [vmem:[#allocation14] sm:$0xff] %vm140_vm1, %v2181_v60 }
0x18d7   :  { %2829 = shalt.err (!%p2826_p4)
}
0x18d8   :  { %s2830_s11 = scalar_lea.hbm %s3380_s12, 128 }
0x18d9   :  { %p2831_p5 = scmp.ne.s32.totalorder %s3380_s12, %s2830_s11  ;;  %p2834_p6 = scmp.lt.u32.totalorder %s2830_s11, %s3380_s12 }
0x18db   :  { %p2836_p7 = pnand %p2834_p6, %p2831_p5 }
0x18dd   :  { %2839 = shalt.err (!%p2836_p7)
}
0x18de   :  { %2192 = dma.vmem_to_hbm [thread:$0]  %s2190_s14, 128, %s3380_s12, [#allocation4]  }
0x18df   :  { %2848 = dma.done.wait [#allocation4], 128  }
0x18e0   :  { %2849 = vsyncadd [#allocation4], 4294967168 }
0x18e1   :  { %2196 = vsyncpa [#allocation3], 1 }
0x18e2   :  { %2197 = vsyncpa [#allocation6], 1 }
0x18e3   :  { %2198 = vsyncpa [#allocation9], 1 }
0x18e4   :  { %2199 = vsyncpa [#allocation12], 1 }
0x18e5   :  { %2200 = vsyncpa [#allocation4], 1 }

</bundles_post_ra>
